<compile_context>
chip_gen: v7x
topology: tpu7x:2x2x1
jax: 0.10.0
libtpu: 0.0.40
codegen_flags: <defaults>
</compile_context>

<pallas_src>
import functools

import jax
import jax.numpy as jnp
import numpy as np
from jax.experimental import pallas as pl
from jax.experimental.pallas import tpu as pltpu


def _make_lstm_kernel(*, num_layers, hidden, seq_len):
    """Builds the Pallas kernel body: whole sequence processed in one invocation."""
    H = hidden
    H3 = 3 * hidden

    def kernel(*refs):
        # ref layout: x (T, B, D), then [W_stacked (D_in+H, 4H), bias_full (B, 4H)]
        # per layer, then out (B, H).
        x_ref = refs[0]
        layer_refs = refs[1:1 + 2 * num_layers]
        out_ref = refs[1 + 2 * num_layers]

        B = x_ref.shape[1]

        # Hoist all weight / bias loads out of the (unrolled) time loop.
        Ws = [layer_refs[2 * l][...] for l in range(num_layers)]
        bs = [layer_refs[2 * l + 1][...] for l in range(num_layers)]

        h = [jnp.zeros((B, H), jnp.float32) for _ in range(num_layers)]
        c = [jnp.zeros((B, H), jnp.float32) for _ in range(num_layers)]

        # Static, fully-unrolled time loop: the recurrence is serial anyway and
        # unrolling gives the scheduler cross-step visibility.
        for t in range(seq_len):
            inp = x_ref[t]                                   # (B, D_in) at layer 0
            for l in range(num_layers):
                zin = jnp.concatenate([inp, h[l]], axis=-1)  # (B, D_in + H)
                gates = (jnp.dot(zin.astype(Ws[l].dtype), Ws[l],
                                 preferred_element_type=jnp.float32)
                         + bs[l])                            # (B, 4H), [i|f|o|g]
                ifo = jax.nn.sigmoid(gates[:, :H3])          # i, f, o in one pass
                g = jnp.tanh(gates[:, H3:])
                i = ifo[:, 0 * H:1 * H]
                f = ifo[:, 1 * H:2 * H]
                o = ifo[:, 2 * H:H3]
                c[l] = f * c[l] + i * g
                h[l] = o * jnp.tanh(c[l])
                inp = h[l]

        out_ref[...] = h[num_layers - 1]

    return kernel


def custom_lstm_forward(x_btd, boundary, params, *, hidden, num_layers,
                        output_size, matmul_dtype=jnp.float32):
    """x_btd: (B, T, D) like PyTorch; boundary: (B, 2). Returns (B, output_size)."""
    B, T, D = x_btd.shape
    B_pad = ((max(B, 8) + 7) // 8) * 8   # fill all 8 sublanes of each vreg

    x_tbd = jnp.transpose(x_btd, (1, 0, 2)).astype(jnp.float32)   # time-major (T, B, D)
    if B_pad != B:
        x_tbd = jnp.pad(x_tbd, ((0, 0), (0, B_pad - B), (0, 0)))
        boundary_p = jnp.pad(boundary, ((0, B_pad - B), (0, 0)))
    else:
        boundary_p = boundary

    layer_args = []
    for l in range(num_layers):
        p = params["layers"][l]
        # Stack [Wx; Uh] so the kernel issues one dot per layer per step.
        W = jnp.concatenate([p["Wx"], p["Uh"]], axis=0).astype(matmul_dtype)
        # Time-invariant boundary forget-gate term, hoisted out of the kernel
        # and folded (padded to [0|binf|0|0]) into the per-layer bias.
        binf = boundary_p @ p["Wb"] + p["bb"]                      # (B_pad, H)
        bias_full = (p["b"] + jnp.concatenate(
            [jnp.zeros((B_pad, hidden), jnp.float32), binf,
             jnp.zeros((B_pad, 2 * hidden), jnp.float32)], axis=-1)
        ).astype(jnp.float32)                                      # (B_pad, 4H)
        layer_args += [W, bias_full]

    kernel = _make_lstm_kernel(num_layers=num_layers, hidden=hidden, seq_len=T)
    vmem = pl.BlockSpec(memory_space=pltpu.MemorySpace.VMEM)

    h_last = pl.pallas_call(
        kernel,
        out_shape=jax.ShapeDtypeStruct((B_pad, hidden), jnp.float32),
        in_specs=[vmem] * (1 + 2 * num_layers),
        out_specs=vmem,
    )(x_tbd, *layer_args)

    # Tiny final FC (H -> output_size, here 1): lane-sparse and executed once,
    # so it stays in plain JAX instead of a ~0%-utilization MXU pass in-kernel.
    return h_last[:B] @ params["Wfc"] + params["bfc"]


def init_params(key, input_size, hidden, num_layers, output_size):
    """Deterministic init mirroring the nn.Linear shapes (combined per gate)."""
    def uniform(key, shape, fan_in):
        bound = 1.0 / np.sqrt(fan_in)
        return jax.random.uniform(key, shape, jnp.float32, -bound, bound)

    keys = jax.random.split(key, num_layers * 5 + 2)
    layers = []
    k_idx = 0
    for l in range(num_layers):
        in_dim = input_size if l == 0 else hidden
        # Wx packs W_i|W_f|W_o|W_g  (stored (in, 4H), i.e. already transposed)
        Wx = uniform(keys[k_idx], (in_dim, 4 * hidden), in_dim); k_idx += 1
        Uh = uniform(keys[k_idx], (hidden, 4 * hidden), hidden); k_idx += 1
        # combined bias b_W + b_U per gate
        b = uniform(keys[k_idx], (1, 4 * hidden), in_dim); k_idx += 1
        Wb = uniform(keys[k_idx], (2, hidden), 2); k_idx += 1
        bb = uniform(keys[k_idx], (1, hidden), 2); k_idx += 1
        layers.append(dict(Wx=Wx, Uh=Uh, b=b, Wb=Wb, bb=bb))
    Wfc = uniform(keys[k_idx], (hidden, output_size), hidden); k_idx += 1
    bfc = uniform(keys[k_idx], (1, output_size), hidden)
    return dict(layers=layers, Wfc=Wfc, bfc=bfc)


def reference_forward(x_btd, boundary, params, *, hidden, num_layers, output_size):
    """Pure-JAX reference matching the PyTorch forward semantics."""
    B, T, D = x_btd.shape
    h = [jnp.zeros((B, hidden), jnp.float32) for _ in range(num_layers)]
    c = [jnp.zeros((B, hidden), jnp.float32) for _ in range(num_layers)]
    H = hidden
    for t in range(T):
        inp = x_btd[:, t, :]
        for l in range(num_layers):
            p = params["layers"][l]
            gates = inp @ p["Wx"] + h[l] @ p["Uh"] + p["b"]
            binf = boundary @ p["Wb"] + p["bb"]
            i = jax.nn.sigmoid(gates[:, 0 * H:1 * H])
            f = jax.nn.sigmoid(gates[:, 1 * H:2 * H] + binf)
            o = jax.nn.sigmoid(gates[:, 2 * H:3 * H])
            g = jnp.tanh(gates[:, 3 * H:4 * H])
            c[l] = f * c[l] + i * g
            h[l] = o * jnp.tanh(c[l])
            inp = h[l]
    return h[-1] @ params["Wfc"] + params["bfc"]


if __name__ == "__main__":
    B, T, D = 4, 8, 16
    HIDDEN, LAYERS, OUT = 32, 2, 1

    key = jax.random.PRNGKey(0)
    kx, kb, kp = jax.random.split(key, 3)
    x = jax.random.normal(kx, (B, T, D), jnp.float32)
    boundary = jax.random.normal(kb, (B, 2), jnp.float32)
    params = init_params(kp, D, HIDDEN, LAYERS, OUT)

    fwd = functools.partial(custom_lstm_forward,
                            hidden=HIDDEN, num_layers=LAYERS, output_size=OUT)

    # f32 path: checked against the pure-JAX reference.
    out = jax.block_until_ready(fwd(x, boundary, params))
    ref = reference_forward(x, boundary, params,
                            hidden=HIDDEN, num_layers=LAYERS, output_size=OUT)
    np.testing.assert_allclose(np.asarray(out), np.asarray(ref),
                               rtol=1e-4, atol=1e-5)

    # bf16 MXU-operand path (v6e/v7x perf variant): just verify it compiles/runs.
    out_bf16 = jax.block_until_ready(
        fwd(x, boundary, params, matmul_dtype=jnp.bfloat16))
    assert out_bf16.shape == out.shape

    print("KERNEL_OK")
</pallas_src>

<mosaic_0001>
module attributes {stable_mosaic.version = 11 : i64} {
  func.func @kernel(%arg0: memref<8x8x16xf32, #tpu.memory_space<vmem>>, %arg1: memref<48x128xf32, #tpu.memory_space<vmem>>, %arg2: memref<8x128xf32, #tpu.memory_space<vmem>>, %arg3: memref<64x128xf32, #tpu.memory_space<vmem>>, %arg4: memref<8x128xf32, #tpu.memory_space<vmem>>, %arg5: memref<8x32xf32, #tpu.memory_space<vmem>>) attributes {dimension_semantics = [], scalar_prefetch = 0 : i64, scratch_operands = 0 : i64, tpu.core_type = #tpu.core_type<tc>} {
    %c0 = arith.constant 0 : index
    %c0_0 = arith.constant 0 : index
    %0 = vector.load %arg1[%c0, %c0_0] : memref<48x128xf32, #tpu.memory_space<vmem>>, vector<48x128xf32>
    %c0_1 = arith.constant 0 : index
    %c0_2 = arith.constant 0 : index
    %1 = vector.load %arg3[%c0_1, %c0_2] : memref<64x128xf32, #tpu.memory_space<vmem>>, vector<64x128xf32>
    %c0_3 = arith.constant 0 : index
    %c0_4 = arith.constant 0 : index
    %2 = vector.load %arg2[%c0_3, %c0_4] : memref<8x128xf32, #tpu.memory_space<vmem>>, vector<8x128xf32>
    %c0_5 = arith.constant 0 : index
    %c0_6 = arith.constant 0 : index
    %3 = vector.load %arg4[%c0_5, %c0_6] : memref<8x128xf32, #tpu.memory_space<vmem>>, vector<8x128xf32>
    %cst = arith.constant 0.000000e+00 : f32
    %4 = vector.broadcast %cst : f32 to vector<8x32xf32>
    %cst_7 = arith.constant 0.000000e+00 : f32
    %5 = vector.broadcast %cst_7 : f32 to vector<8x32xf32>
    %cst_8 = arith.constant 0.000000e+00 : f32
    %6 = vector.broadcast %cst_8 : f32 to vector<8x32xf32>
    %cst_9 = arith.constant 0.000000e+00 : f32
    %7 = vector.broadcast %cst_9 : f32 to vector<8x32xf32>
    %c0_10 = arith.constant 0 : index
    %c0_11 = arith.constant 0 : index
    %c0_12 = arith.constant 0 : index
    %8 = vector.load %arg0[%c0_10, %c0_11, %c0_12] : memref<8x8x16xf32, #tpu.memory_space<vmem>>, vector<1x8x16xf32>
    %9 = vector.shape_cast %8 : vector<1x8x16xf32> to vector<8x16xf32>
    %10 = tpu.concatenate %9, %4 in 1 : vector<8x16xf32>, vector<8x32xf32> -> vector<8x48xf32>
    %cst_13 = arith.constant dense<0.000000e+00> : vector<8x128xf32>
    %11 = tpu.matmul %10, %0, %cst_13 {dimension_numbers = #tpu.dot_dimension_numbers<[1], [0], [0], [1], [0, 0, 1, 1], [], []>} : vector<8x48xf32>, vector<48x128xf32>, vector<8x128xf32> -> vector<8x128xf32>
    %12 = arith.addf %11, %2 : vector<8x128xf32>
    %13 = vector.extract_strided_slice %12 {offsets = [0, 0], sizes = [8, 96], strides = [1, 1]} : vector<8x128xf32> to vector<8x96xf32>
    %14 = arith.negf %13 : vector<8x96xf32>
    %15 = math.exp %14 : vector<8x96xf32>
    %cst_14 = arith.constant 1.000000e+00 : f32
    %16 = vector.broadcast %cst_14 : f32 to vector<8x96xf32>
    %17 = arith.addf %16, %15 : vector<8x96xf32>
    %18 = arith.divf %16, %17 : vector<8x96xf32>
    %19 = vector.extract_strided_slice %12 {offsets = [0, 96], sizes = [8, 32], strides = [1, 1]} : vector<8x128xf32> to vector<8x32xf32>
    %20 = math.tanh %19 : vector<8x32xf32>
    %21 = vector.extract_strided_slice %18 {offsets = [0, 0], sizes = [8, 32], strides = [1, 1]} : vector<8x96xf32> to vector<8x32xf32>
    %22 = vector.extract_strided_slice %18 {offsets = [0, 32], sizes = [8, 32], strides = [1, 1]} : vector<8x96xf32> to vector<8x32xf32>
    %23 = vector.extract_strided_slice %18 {offsets = [0, 64], sizes = [8, 32], strides = [1, 1]} : vector<8x96xf32> to vector<8x32xf32>
    %24 = arith.mulf %22, %6 : vector<8x32xf32>
    %25 = arith.mulf %21, %20 : vector<8x32xf32>
    %26 = arith.addf %24, %25 : vector<8x32xf32>
    %27 = math.tanh %26 : vector<8x32xf32>
    %28 = arith.mulf %23, %27 : vector<8x32xf32>
    %29 = tpu.concatenate %28, %5 in 1 : vector<8x32xf32>, vector<8x32xf32> -> vector<8x64xf32>
    %cst_15 = arith.constant dense<0.000000e+00> : vector<8x128xf32>
    %30 = tpu.matmul %29, %1, %cst_15 {dimension_numbers = #tpu.dot_dimension_numbers<[1], [0], [0], [1], [0, 0, 1, 1], [], []>} : vector<8x64xf32>, vector<64x128xf32>, vector<8x128xf32> -> vector<8x128xf32>
    %31 = arith.addf %30, %3 : vector<8x128xf32>
    %32 = vector.extract_strided_slice %31 {offsets = [0, 0], sizes = [8, 96], strides = [1, 1]} : vector<8x128xf32> to vector<8x96xf32>
    %33 = arith.negf %32 : vector<8x96xf32>
    %34 = math.exp %33 : vector<8x96xf32>
    %cst_16 = arith.constant 1.000000e+00 : f32
    %35 = vector.broadcast %cst_16 : f32 to vector<8x96xf32>
    %36 = arith.addf %35, %34 : vector<8x96xf32>
    %37 = arith.divf %35, %36 : vector<8x96xf32>
    %38 = vector.extract_strided_slice %31 {offsets = [0, 96], sizes = [8, 32], strides = [1, 1]} : vector<8x128xf32> to vector<8x32xf32>
    %39 = math.tanh %38 : vector<8x32xf32>
    %40 = vector.extract_strided_slice %37 {offsets = [0, 0], sizes = [8, 32], strides = [1, 1]} : vector<8x96xf32> to vector<8x32xf32>
    %41 = vector.extract_strided_slice %37 {offsets = [0, 32], sizes = [8, 32], strides = [1, 1]} : vector<8x96xf32> to vector<8x32xf32>
    %42 = vector.extract_strided_slice %37 {offsets = [0, 64], sizes = [8, 32], strides = [1, 1]} : vector<8x96xf32> to vector<8x32xf32>
    %43 = arith.mulf %41, %7 : vector<8x32xf32>
    %44 = arith.mulf %40, %39 : vector<8x32xf32>
    %45 = arith.addf %43, %44 : vector<8x32xf32>
    %46 = math.tanh %45 : vector<8x32xf32>
    %47 = arith.mulf %42, %46 : vector<8x32xf32>
    %c1 = arith.constant 1 : index
    %c0_17 = arith.constant 0 : index
    %c0_18 = arith.constant 0 : index
    %48 = vector.load %arg0[%c1, %c0_17, %c0_18] : memref<8x8x16xf32, #tpu.memory_space<vmem>>, vector<1x8x16xf32>
    %49 = vector.shape_cast %48 : vector<1x8x16xf32> to vector<8x16xf32>
    %50 = tpu.concatenate %49, %28 in 1 : vector<8x16xf32>, vector<8x32xf32> -> vector<8x48xf32>
    %cst_19 = arith.constant dense<0.000000e+00> : vector<8x128xf32>
    %51 = tpu.matmul %50, %0, %cst_19 {dimension_numbers = #tpu.dot_dimension_numbers<[1], [0], [0], [1], [0, 0, 1, 1], [], []>} : vector<8x48xf32>, vector<48x128xf32>, vector<8x128xf32> -> vector<8x128xf32>
    %52 = arith.addf %51, %2 : vector<8x128xf32>
    %53 = vector.extract_strided_slice %52 {offsets = [0, 0], sizes = [8, 96], strides = [1, 1]} : vector<8x128xf32> to vector<8x96xf32>
    %54 = arith.negf %53 : vector<8x96xf32>
    %55 = math.exp %54 : vector<8x96xf32>
    %cst_20 = arith.constant 1.000000e+00 : f32
    %56 = vector.broadcast %cst_20 : f32 to vector<8x96xf32>
    %57 = arith.addf %56, %55 : vector<8x96xf32>
    %58 = arith.divf %56, %57 : vector<8x96xf32>
    %59 = vector.extract_strided_slice %52 {offsets = [0, 96], sizes = [8, 32], strides = [1, 1]} : vector<8x128xf32> to vector<8x32xf32>
    %60 = math.tanh %59 : vector<8x32xf32>
    %61 = vector.extract_strided_slice %58 {offsets = [0, 0], sizes = [8, 32], strides = [1, 1]} : vector<8x96xf32> to vector<8x32xf32>
    %62 = vector.extract_strided_slice %58 {offsets = [0, 32], sizes = [8, 32], strides = [1, 1]} : vector<8x96xf32> to vector<8x32xf32>
    %63 = vector.extract_strided_slice %58 {offsets = [0, 64], sizes = [8, 32], strides = [1, 1]} : vector<8x96xf32> to vector<8x32xf32>
    %64 = arith.mulf %62, %26 : vector<8x32xf32>
    %65 = arith.mulf %61, %60 : vector<8x32xf32>
    %66 = arith.addf %64, %65 : vector<8x32xf32>
    %67 = math.tanh %66 : vector<8x32xf32>
    %68 = arith.mulf %63, %67 : vector<8x32xf32>
    %69 = tpu.concatenate %68, %47 in 1 : vector<8x32xf32>, vector<8x32xf32> -> vector<8x64xf32>
    %cst_21 = arith.constant dense<0.000000e+00> : vector<8x128xf32>
    %70 = tpu.matmul %69, %1, %cst_21 {dimension_numbers = #tpu.dot_dimension_numbers<[1], [0], [0], [1], [0, 0, 1, 1], [], []>} : vector<8x64xf32>, vector<64x128xf32>, vector<8x128xf32> -> vector<8x128xf32>
    %71 = arith.addf %70, %3 : vector<8x128xf32>
    %72 = vector.extract_strided_slice %71 {offsets = [0, 0], sizes = [8, 96], strides = [1, 1]} : vector<8x128xf32> to vector<8x96xf32>
    %73 = arith.negf %72 : vector<8x96xf32>
    %74 = math.exp %73 : vector<8x96xf32>
    %cst_22 = arith.constant 1.000000e+00 : f32
    %75 = vector.broadcast %cst_22 : f32 to vector<8x96xf32>
    %76 = arith.addf %75, %74 : vector<8x96xf32>
    %77 = arith.divf %75, %76 : vector<8x96xf32>
    %78 = vector.extract_strided_slice %71 {offsets = [0, 96], sizes = [8, 32], strides = [1, 1]} : vector<8x128xf32> to vector<8x32xf32>
    %79 = math.tanh %78 : vector<8x32xf32>
    %80 = vector.extract_strided_slice %77 {offsets = [0, 0], sizes = [8, 32], strides = [1, 1]} : vector<8x96xf32> to vector<8x32xf32>
    %81 = vector.extract_strided_slice %77 {offsets = [0, 32], sizes = [8, 32], strides = [1, 1]} : vector<8x96xf32> to vector<8x32xf32>
    %82 = vector.extract_strided_slice %77 {offsets = [0, 64], sizes = [8, 32], strides = [1, 1]} : vector<8x96xf32> to vector<8x32xf32>
    %83 = arith.mulf %81, %45 : vector<8x32xf32>
    %84 = arith.mulf %80, %79 : vector<8x32xf32>
    %85 = arith.addf %83, %84 : vector<8x32xf32>
    %86 = math.tanh %85 : vector<8x32xf32>
    %87 = arith.mulf %82, %86 : vector<8x32xf32>
    %c2 = arith.constant 2 : index
    %c0_23 = arith.constant 0 : index
    %c0_24 = arith.constant 0 : index
    %88 = vector.load %arg0[%c2, %c0_23, %c0_24] : memref<8x8x16xf32, #tpu.memory_space<vmem>>, vector<1x8x16xf32>
    %89 = vector.shape_cast %88 : vector<1x8x16xf32> to vector<8x16xf32>
    %90 = tpu.concatenate %89, %68 in 1 : vector<8x16xf32>, vector<8x32xf32> -> vector<8x48xf32>
    %cst_25 = arith.constant dense<0.000000e+00> : vector<8x128xf32>
    %91 = tpu.matmul %90, %0, %cst_25 {dimension_numbers = #tpu.dot_dimension_numbers<[1], [0], [0], [1], [0, 0, 1, 1], [], []>} : vector<8x48xf32>, vector<48x128xf32>, vector<8x128xf32> -> vector<8x128xf32>
    %92 = arith.addf %91, %2 : vector<8x128xf32>
    %93 = vector.extract_strided_slice %92 {offsets = [0, 0], sizes = [8, 96], strides = [1, 1]} : vector<8x128xf32> to vector<8x96xf32>
    %94 = arith.negf %93 : vector<8x96xf32>
    %95 = math.exp %94 : vector<8x96xf32>
    %cst_26 = arith.constant 1.000000e+00 : f32
    %96 = vector.broadcast %cst_26 : f32 to vector<8x96xf32>
    %97 = arith.addf %96, %95 : vector<8x96xf32>
    %98 = arith.divf %96, %97 : vector<8x96xf32>
    %99 = vector.extract_strided_slice %92 {offsets = [0, 96], sizes = [8, 32], strides = [1, 1]} : vector<8x128xf32> to vector<8x32xf32>
    %100 = math.tanh %99 : vector<8x32xf32>
    %101 = vector.extract_strided_slice %98 {offsets = [0, 0], sizes = [8, 32], strides = [1, 1]} : vector<8x96xf32> to vector<8x32xf32>
    %102 = vector.extract_strided_slice %98 {offsets = [0, 32], sizes = [8, 32], strides = [1, 1]} : vector<8x96xf32> to vector<8x32xf32>
    %103 = vector.extract_strided_slice %98 {offsets = [0, 64], sizes = [8, 32], strides = [1, 1]} : vector<8x96xf32> to vector<8x32xf32>
    %104 = arith.mulf %102, %66 : vector<8x32xf32>
    %105 = arith.mulf %101, %100 : vector<8x32xf32>
    %106 = arith.addf %104, %105 : vector<8x32xf32>
    %107 = math.tanh %106 : vector<8x32xf32>
    %108 = arith.mulf %103, %107 : vector<8x32xf32>
    %109 = tpu.concatenate %108, %87 in 1 : vector<8x32xf32>, vector<8x32xf32> -> vector<8x64xf32>
    %cst_27 = arith.constant dense<0.000000e+00> : vector<8x128xf32>
    %110 = tpu.matmul %109, %1, %cst_27 {dimension_numbers = #tpu.dot_dimension_numbers<[1], [0], [0], [1], [0, 0, 1, 1], [], []>} : vector<8x64xf32>, vector<64x128xf32>, vector<8x128xf32> -> vector<8x128xf32>
    %111 = arith.addf %110, %3 : vector<8x128xf32>
    %112 = vector.extract_strided_slice %111 {offsets = [0, 0], sizes = [8, 96], strides = [1, 1]} : vector<8x128xf32> to vector<8x96xf32>
    %113 = arith.negf %112 : vector<8x96xf32>
    %114 = math.exp %113 : vector<8x96xf32>
    %cst_28 = arith.constant 1.000000e+00 : f32
    %115 = vector.broadcast %cst_28 : f32 to vector<8x96xf32>
    %116 = arith.addf %115, %114 : vector<8x96xf32>
    %117 = arith.divf %115, %116 : vector<8x96xf32>
    %118 = vector.extract_strided_slice %111 {offsets = [0, 96], sizes = [8, 32], strides = [1, 1]} : vector<8x128xf32> to vector<8x32xf32>
    %119 = math.tanh %118 : vector<8x32xf32>
    %120 = vector.extract_strided_slice %117 {offsets = [0, 0], sizes = [8, 32], strides = [1, 1]} : vector<8x96xf32> to vector<8x32xf32>
    %121 = vector.extract_strided_slice %117 {offsets = [0, 32], sizes = [8, 32], strides = [1, 1]} : vector<8x96xf32> to vector<8x32xf32>
    %122 = vector.extract_strided_slice %117 {offsets = [0, 64], sizes = [8, 32], strides = [1, 1]} : vector<8x96xf32> to vector<8x32xf32>
    %123 = arith.mulf %121, %85 : vector<8x32xf32>
    %124 = arith.mulf %120, %119 : vector<8x32xf32>
    %125 = arith.addf %123, %124 : vector<8x32xf32>
    %126 = math.tanh %125 : vector<8x32xf32>
    %127 = arith.mulf %122, %126 : vector<8x32xf32>
    %c3 = arith.constant 3 : index
    %c0_29 = arith.constant 0 : index
    %c0_30 = arith.constant 0 : index
    %128 = vector.load %arg0[%c3, %c0_29, %c0_30] : memref<8x8x16xf32, #tpu.memory_space<vmem>>, vector<1x8x16xf32>
    %129 = vector.shape_cast %128 : vector<1x8x16xf32> to vector<8x16xf32>
    %130 = tpu.concatenate %129, %108 in 1 : vector<8x16xf32>, vector<8x32xf32> -> vector<8x48xf32>
    %cst_31 = arith.constant dense<0.000000e+00> : vector<8x128xf32>
    %131 = tpu.matmul %130, %0, %cst_31 {dimension_numbers = #tpu.dot_dimension_numbers<[1], [0], [0], [1], [0, 0, 1, 1], [], []>} : vector<8x48xf32>, vector<48x128xf32>, vector<8x128xf32> -> vector<8x128xf32>
    %132 = arith.addf %131, %2 : vector<8x128xf32>
    %133 = vector.extract_strided_slice %132 {offsets = [0, 0], sizes = [8, 96], strides = [1, 1]} : vector<8x128xf32> to vector<8x96xf32>
    %134 = arith.negf %133 : vector<8x96xf32>
    %135 = math.exp %134 : vector<8x96xf32>
    %cst_32 = arith.constant 1.000000e+00 : f32
    %136 = vector.broadcast %cst_32 : f32 to vector<8x96xf32>
    %137 = arith.addf %136, %135 : vector<8x96xf32>
    %138 = arith.divf %136, %137 : vector<8x96xf32>
    %139 = vector.extract_strided_slice %132 {offsets = [0, 96], sizes = [8, 32], strides = [1, 1]} : vector<8x128xf32> to vector<8x32xf32>
    %140 = math.tanh %139 : vector<8x32xf32>
    %141 = vector.extract_strided_slice %138 {offsets = [0, 0], sizes = [8, 32], strides = [1, 1]} : vector<8x96xf32> to vector<8x32xf32>
    %142 = vector.extract_strided_slice %138 {offsets = [0, 32], sizes = [8, 32], strides = [1, 1]} : vector<8x96xf32> to vector<8x32xf32>
    %143 = vector.extract_strided_slice %138 {offsets = [0, 64], sizes = [8, 32], strides = [1, 1]} : vector<8x96xf32> to vector<8x32xf32>
    %144 = arith.mulf %142, %106 : vector<8x32xf32>
    %145 = arith.mulf %141, %140 : vector<8x32xf32>
    %146 = arith.addf %144, %145 : vector<8x32xf32>
    %147 = math.tanh %146 : vector<8x32xf32>
    %148 = arith.mulf %143, %147 : vector<8x32xf32>
    %149 = tpu.concatenate %148, %127 in 1 : vector<8x32xf32>, vector<8x32xf32> -> vector<8x64xf32>
    %cst_33 = arith.constant dense<0.000000e+00> : vector<8x128xf32>
    %150 = tpu.matmul %149, %1, %cst_33 {dimension_numbers = #tpu.dot_dimension_numbers<[1], [0], [0], [1], [0, 0, 1, 1], [], []>} : vector<8x64xf32>, vector<64x128xf32>, vector<8x128xf32> -> vector<8x128xf32>
    %151 = arith.addf %150, %3 : vector<8x128xf32>
    %152 = vector.extract_strided_slice %151 {offsets = [0, 0], sizes = [8, 96], strides = [1, 1]} : vector<8x128xf32> to vector<8x96xf32>
    %153 = arith.negf %152 : vector<8x96xf32>
    %154 = math.exp %153 : vector<8x96xf32>
    %cst_34 = arith.constant 1.000000e+00 : f32
    %155 = vector.broadcast %cst_34 : f32 to vector<8x96xf32>
    %156 = arith.addf %155, %154 : vector<8x96xf32>
    %157 = arith.divf %155, %156 : vector<8x96xf32>
    %158 = vector.extract_strided_slice %151 {offsets = [0, 96], sizes = [8, 32], strides = [1, 1]} : vector<8x128xf32> to vector<8x32xf32>
    %159 = math.tanh %158 : vector<8x32xf32>
    %160 = vector.extract_strided_slice %157 {offsets = [0, 0], sizes = [8, 32], strides = [1, 1]} : vector<8x96xf32> to vector<8x32xf32>
    %161 = vector.extract_strided_slice %157 {offsets = [0, 32], sizes = [8, 32], strides = [1, 1]} : vector<8x96xf32> to vector<8x32xf32>
    %162 = vector.extract_strided_slice %157 {offsets = [0, 64], sizes = [8, 32], strides = [1, 1]} : vector<8x96xf32> to vector<8x32xf32>
    %163 = arith.mulf %161, %125 : vector<8x32xf32>
    %164 = arith.mulf %160, %159 : vector<8x32xf32>
    %165 = arith.addf %163, %164 : vector<8x32xf32>
    %166 = math.tanh %165 : vector<8x32xf32>
    %167 = arith.mulf %162, %166 : vector<8x32xf32>
    %c4 = arith.constant 4 : index
    %c0_35 = arith.constant 0 : index
    %c0_36 = arith.constant 0 : index
    %168 = vector.load %arg0[%c4, %c0_35, %c0_36] : memref<8x8x16xf32, #tpu.memory_space<vmem>>, vector<1x8x16xf32>
    %169 = vector.shape_cast %168 : vector<1x8x16xf32> to vector<8x16xf32>
    %170 = tpu.concatenate %169, %148 in 1 : vector<8x16xf32>, vector<8x32xf32> -> vector<8x48xf32>
    %cst_37 = arith.constant dense<0.000000e+00> : vector<8x128xf32>
    %171 = tpu.matmul %170, %0, %cst_37 {dimension_numbers = #tpu.dot_dimension_numbers<[1], [0], [0], [1], [0, 0, 1, 1], [], []>} : vector<8x48xf32>, vector<48x128xf32>, vector<8x128xf32> -> vector<8x128xf32>
    %172 = arith.addf %171, %2 : vector<8x128xf32>
    %173 = vector.extract_strided_slice %172 {offsets = [0, 0], sizes = [8, 96], strides = [1, 1]} : vector<8x128xf32> to vector<8x96xf32>
    %174 = arith.negf %173 : vector<8x96xf32>
    %175 = math.exp %174 : vector<8x96xf32>
    %cst_38 = arith.constant 1.000000e+00 : f32
    %176 = vector.broadcast %cst_38 : f32 to vector<8x96xf32>
    %177 = arith.addf %176, %175 : vector<8x96xf32>
    %178 = arith.divf %176, %177 : vector<8x96xf32>
    %179 = vector.extract_strided_slice %172 {offsets = [0, 96], sizes = [8, 32], strides = [1, 1]} : vector<8x128xf32> to vector<8x32xf32>
    %180 = math.tanh %179 : vector<8x32xf32>
    %181 = vector.extract_strided_slice %178 {offsets = [0, 0], sizes = [8, 32], strides = [1, 1]} : vector<8x96xf32> to vector<8x32xf32>
    %182 = vector.extract_strided_slice %178 {offsets = [0, 32], sizes = [8, 32], strides = [1, 1]} : vector<8x96xf32> to vector<8x32xf32>
    %183 = vector.extract_strided_slice %178 {offsets = [0, 64], sizes = [8, 32], strides = [1, 1]} : vector<8x96xf32> to vector<8x32xf32>
    %184 = arith.mulf %182, %146 : vector<8x32xf32>
    %185 = arith.mulf %181, %180 : vector<8x32xf32>
    %186 = arith.addf %184, %185 : vector<8x32xf32>
    %187 = math.tanh %186 : vector<8x32xf32>
    %188 = arith.mulf %183, %187 : vector<8x32xf32>
    %189 = tpu.concatenate %188, %167 in 1 : vector<8x32xf32>, vector<8x32xf32> -> vector<8x64xf32>
    %cst_39 = arith.constant dense<0.000000e+00> : vector<8x128xf32>
    %190 = tpu.matmul %189, %1, %cst_39 {dimension_numbers = #tpu.dot_dimension_numbers<[1], [0], [0], [1], [0, 0, 1, 1], [], []>} : vector<8x64xf32>, vector<64x128xf32>, vector<8x128xf32> -> vector<8x128xf32>
    %191 = arith.addf %190, %3 : vector<8x128xf32>
    %192 = vector.extract_strided_slice %191 {offsets = [0, 0], sizes = [8, 96], strides = [1, 1]} : vector<8x128xf32> to vector<8x96xf32>
    %193 = arith.negf %192 : vector<8x96xf32>
    %194 = math.exp %193 : vector<8x96xf32>
    %cst_40 = arith.constant 1.000000e+00 : f32
    %195 = vector.broadcast %cst_40 : f32 to vector<8x96xf32>
    %196 = arith.addf %195, %194 : vector<8x96xf32>
    %197 = arith.divf %195, %196 : vector<8x96xf32>
    %198 = vector.extract_strided_slice %191 {offsets = [0, 96], sizes = [8, 32], strides = [1, 1]} : vector<8x128xf32> to vector<8x32xf32>
    %199 = math.tanh %198 : vector<8x32xf32>
    %200 = vector.extract_strided_slice %197 {offsets = [0, 0], sizes = [8, 32], strides = [1, 1]} : vector<8x96xf32> to vector<8x32xf32>
    %201 = vector.extract_strided_slice %197 {offsets = [0, 32], sizes = [8, 32], strides = [1, 1]} : vector<8x96xf32> to vector<8x32xf32>
    %202 = vector.extract_strided_slice %197 {offsets = [0, 64], sizes = [8, 32], strides = [1, 1]} : vector<8x96xf32> to vector<8x32xf32>
    %203 = arith.mulf %201, %165 : vector<8x32xf32>
    %204 = arith.mulf %200, %199 : vector<8x32xf32>
    %205 = arith.addf %203, %204 : vector<8x32xf32>
    %206 = math.tanh %205 : vector<8x32xf32>
    %207 = arith.mulf %202, %206 : vector<8x32xf32>
    %c5 = arith.constant 5 : index
    %c0_41 = arith.constant 0 : index
    %c0_42 = arith.constant 0 : index
    %208 = vector.load %arg0[%c5, %c0_41, %c0_42] : memref<8x8x16xf32, #tpu.memory_space<vmem>>, vector<1x8x16xf32>
    %209 = vector.shape_cast %208 : vector<1x8x16xf32> to vector<8x16xf32>
    %210 = tpu.concatenate %209, %188 in 1 : vector<8x16xf32>, vector<8x32xf32> -> vector<8x48xf32>
    %cst_43 = arith.constant dense<0.000000e+00> : vector<8x128xf32>
    %211 = tpu.matmul %210, %0, %cst_43 {dimension_numbers = #tpu.dot_dimension_numbers<[1], [0], [0], [1], [0, 0, 1, 1], [], []>} : vector<8x48xf32>, vector<48x128xf32>, vector<8x128xf32> -> vector<8x128xf32>
    %212 = arith.addf %211, %2 : vector<8x128xf32>
    %213 = vector.extract_strided_slice %212 {offsets = [0, 0], sizes = [8, 96], strides = [1, 1]} : vector<8x128xf32> to vector<8x96xf32>
    %214 = arith.negf %213 : vector<8x96xf32>
    %215 = math.exp %214 : vector<8x96xf32>
    %cst_44 = arith.constant 1.000000e+00 : f32
    %216 = vector.broadcast %cst_44 : f32 to vector<8x96xf32>
    %217 = arith.addf %216, %215 : vector<8x96xf32>
    %218 = arith.divf %216, %217 : vector<8x96xf32>
    %219 = vector.extract_strided_slice %212 {offsets = [0, 96], sizes = [8, 32], strides = [1, 1]} : vector<8x128xf32> to vector<8x32xf32>
    %220 = math.tanh %219 : vector<8x32xf32>
    %221 = vector.extract_strided_slice %218 {offsets = [0, 0], sizes = [8, 32], strides = [1, 1]} : vector<8x96xf32> to vector<8x32xf32>
    %222 = vector.extract_strided_slice %218 {offsets = [0, 32], sizes = [8, 32], strides = [1, 1]} : vector<8x96xf32> to vector<8x32xf32>
    %223 = vector.extract_strided_slice %218 {offsets = [0, 64], sizes = [8, 32], strides = [1, 1]} : vector<8x96xf32> to vector<8x32xf32>
    %224 = arith.mulf %222, %186 : vector<8x32xf32>
    %225 = arith.mulf %221, %220 : vector<8x32xf32>
    %226 = arith.addf %224, %225 : vector<8x32xf32>
    %227 = math.tanh %226 : vector<8x32xf32>
    %228 = arith.mulf %223, %227 : vector<8x32xf32>
    %229 = tpu.concatenate %228, %207 in 1 : vector<8x32xf32>, vector<8x32xf32> -> vector<8x64xf32>
    %cst_45 = arith.constant dense<0.000000e+00> : vector<8x128xf32>
    %230 = tpu.matmul %229, %1, %cst_45 {dimension_numbers = #tpu.dot_dimension_numbers<[1], [0], [0], [1], [0, 0, 1, 1], [], []>} : vector<8x64xf32>, vector<64x128xf32>, vector<8x128xf32> -> vector<8x128xf32>
    %231 = arith.addf %230, %3 : vector<8x128xf32>
    %232 = vector.extract_strided_slice %231 {offsets = [0, 0], sizes = [8, 96], strides = [1, 1]} : vector<8x128xf32> to vector<8x96xf32>
    %233 = arith.negf %232 : vector<8x96xf32>
    %234 = math.exp %233 : vector<8x96xf32>
    %cst_46 = arith.constant 1.000000e+00 : f32
    %235 = vector.broadcast %cst_46 : f32 to vector<8x96xf32>
    %236 = arith.addf %235, %234 : vector<8x96xf32>
    %237 = arith.divf %235, %236 : vector<8x96xf32>
    %238 = vector.extract_strided_slice %231 {offsets = [0, 96], sizes = [8, 32], strides = [1, 1]} : vector<8x128xf32> to vector<8x32xf32>
    %239 = math.tanh %238 : vector<8x32xf32>
    %240 = vector.extract_strided_slice %237 {offsets = [0, 0], sizes = [8, 32], strides = [1, 1]} : vector<8x96xf32> to vector<8x32xf32>
    %241 = vector.extract_strided_slice %237 {offsets = [0, 32], sizes = [8, 32], strides = [1, 1]} : vector<8x96xf32> to vector<8x32xf32>
    %242 = vector.extract_strided_slice %237 {offsets = [0, 64], sizes = [8, 32], strides = [1, 1]} : vector<8x96xf32> to vector<8x32xf32>
    %243 = arith.mulf %241, %205 : vector<8x32xf32>
    %244 = arith.mulf %240, %239 : vector<8x32xf32>
    %245 = arith.addf %243, %244 : vector<8x32xf32>
    %246 = math.tanh %245 : vector<8x32xf32>
    %247 = arith.mulf %242, %246 : vector<8x32xf32>
    %c6 = arith.constant 6 : index
    %c0_47 = arith.constant 0 : index
    %c0_48 = arith.constant 0 : index
    %248 = vector.load %arg0[%c6, %c0_47, %c0_48] : memref<8x8x16xf32, #tpu.memory_space<vmem>>, vector<1x8x16xf32>
    %249 = vector.shape_cast %248 : vector<1x8x16xf32> to vector<8x16xf32>
    %250 = tpu.concatenate %249, %228 in 1 : vector<8x16xf32>, vector<8x32xf32> -> vector<8x48xf32>
    %cst_49 = arith.constant dense<0.000000e+00> : vector<8x128xf32>
    %251 = tpu.matmul %250, %0, %cst_49 {dimension_numbers = #tpu.dot_dimension_numbers<[1], [0], [0], [1], [0, 0, 1, 1], [], []>} : vector<8x48xf32>, vector<48x128xf32>, vector<8x128xf32> -> vector<8x128xf32>
    %252 = arith.addf %251, %2 : vector<8x128xf32>
    %253 = vector.extract_strided_slice %252 {offsets = [0, 0], sizes = [8, 96], strides = [1, 1]} : vector<8x128xf32> to vector<8x96xf32>
    %254 = arith.negf %253 : vector<8x96xf32>
    %255 = math.exp %254 : vector<8x96xf32>
    %cst_50 = arith.constant 1.000000e+00 : f32
    %256 = vector.broadcast %cst_50 : f32 to vector<8x96xf32>
    %257 = arith.addf %256, %255 : vector<8x96xf32>
    %258 = arith.divf %256, %257 : vector<8x96xf32>
    %259 = vector.extract_strided_slice %252 {offsets = [0, 96], sizes = [8, 32], strides = [1, 1]} : vector<8x128xf32> to vector<8x32xf32>
    %260 = math.tanh %259 : vector<8x32xf32>
    %261 = vector.extract_strided_slice %258 {offsets = [0, 0], sizes = [8, 32], strides = [1, 1]} : vector<8x96xf32> to vector<8x32xf32>
    %262 = vector.extract_strided_slice %258 {offsets = [0, 32], sizes = [8, 32], strides = [1, 1]} : vector<8x96xf32> to vector<8x32xf32>
    %263 = vector.extract_strided_slice %258 {offsets = [0, 64], sizes = [8, 32], strides = [1, 1]} : vector<8x96xf32> to vector<8x32xf32>
    %264 = arith.mulf %262, %226 : vector<8x32xf32>
    %265 = arith.mulf %261, %260 : vector<8x32xf32>
    %266 = arith.addf %264, %265 : vector<8x32xf32>
    %267 = math.tanh %266 : vector<8x32xf32>
    %268 = arith.mulf %263, %267 : vector<8x32xf32>
    %269 = tpu.concatenate %268, %247 in 1 : vector<8x32xf32>, vector<8x32xf32> -> vector<8x64xf32>
    %cst_51 = arith.constant dense<0.000000e+00> : vector<8x128xf32>
    %270 = tpu.matmul %269, %1, %cst_51 {dimension_numbers = #tpu.dot_dimension_numbers<[1], [0], [0], [1], [0, 0, 1, 1], [], []>} : vector<8x64xf32>, vector<64x128xf32>, vector<8x128xf32> -> vector<8x128xf32>
    %271 = arith.addf %270, %3 : vector<8x128xf32>
    %272 = vector.extract_strided_slice %271 {offsets = [0, 0], sizes = [8, 96], strides = [1, 1]} : vector<8x128xf32> to vector<8x96xf32>
    %273 = arith.negf %272 : vector<8x96xf32>
    %274 = math.exp %273 : vector<8x96xf32>
    %cst_52 = arith.constant 1.000000e+00 : f32
    %275 = vector.broadcast %cst_52 : f32 to vector<8x96xf32>
    %276 = arith.addf %275, %274 : vector<8x96xf32>
    %277 = arith.divf %275, %276 : vector<8x96xf32>
    %278 = vector.extract_strided_slice %271 {offsets = [0, 96], sizes = [8, 32], strides = [1, 1]} : vector<8x128xf32> to vector<8x32xf32>
    %279 = math.tanh %278 : vector<8x32xf32>
    %280 = vector.extract_strided_slice %277 {offsets = [0, 0], sizes = [8, 32], strides = [1, 1]} : vector<8x96xf32> to vector<8x32xf32>
    %281 = vector.extract_strided_slice %277 {offsets = [0, 32], sizes = [8, 32], strides = [1, 1]} : vector<8x96xf32> to vector<8x32xf32>
    %282 = vector.extract_strided_slice %277 {offsets = [0, 64], sizes = [8, 32], strides = [1, 1]} : vector<8x96xf32> to vector<8x32xf32>
    %283 = arith.mulf %281, %245 : vector<8x32xf32>
    %284 = arith.mulf %280, %279 : vector<8x32xf32>
    %285 = arith.addf %283, %284 : vector<8x32xf32>
    %286 = math.tanh %285 : vector<8x32xf32>
    %287 = arith.mulf %282, %286 : vector<8x32xf32>
    %c7 = arith.constant 7 : index
    %c0_53 = arith.constant 0 : index
    %c0_54 = arith.constant 0 : index
    %288 = vector.load %arg0[%c7, %c0_53, %c0_54] : memref<8x8x16xf32, #tpu.memory_space<vmem>>, vector<1x8x16xf32>
    %289 = vector.shape_cast %288 : vector<1x8x16xf32> to vector<8x16xf32>
    %290 = tpu.concatenate %289, %268 in 1 : vector<8x16xf32>, vector<8x32xf32> -> vector<8x48xf32>
    %cst_55 = arith.constant dense<0.000000e+00> : vector<8x128xf32>
    %291 = tpu.matmul %290, %0, %cst_55 {dimension_numbers = #tpu.dot_dimension_numbers<[1], [0], [0], [1], [0, 0, 1, 1], [], []>} : vector<8x48xf32>, vector<48x128xf32>, vector<8x128xf32> -> vector<8x128xf32>
    %292 = arith.addf %291, %2 : vector<8x128xf32>
    %293 = vector.extract_strided_slice %292 {offsets = [0, 0], sizes = [8, 96], strides = [1, 1]} : vector<8x128xf32> to vector<8x96xf32>
    %294 = arith.negf %293 : vector<8x96xf32>
    %295 = math.exp %294 : vector<8x96xf32>
    %cst_56 = arith.constant 1.000000e+00 : f32
    %296 = vector.broadcast %cst_56 : f32 to vector<8x96xf32>
    %297 = arith.addf %296, %295 : vector<8x96xf32>
    %298 = arith.divf %296, %297 : vector<8x96xf32>
    %299 = vector.extract_strided_slice %292 {offsets = [0, 96], sizes = [8, 32], strides = [1, 1]} : vector<8x128xf32> to vector<8x32xf32>
    %300 = math.tanh %299 : vector<8x32xf32>
    %301 = vector.extract_strided_slice %298 {offsets = [0, 0], sizes = [8, 32], strides = [1, 1]} : vector<8x96xf32> to vector<8x32xf32>
    %302 = vector.extract_strided_slice %298 {offsets = [0, 32], sizes = [8, 32], strides = [1, 1]} : vector<8x96xf32> to vector<8x32xf32>
    %303 = vector.extract_strided_slice %298 {offsets = [0, 64], sizes = [8, 32], strides = [1, 1]} : vector<8x96xf32> to vector<8x32xf32>
    %304 = arith.mulf %302, %266 : vector<8x32xf32>
    %305 = arith.mulf %301, %300 : vector<8x32xf32>
    %306 = arith.addf %304, %305 : vector<8x32xf32>
    %307 = math.tanh %306 : vector<8x32xf32>
    %308 = arith.mulf %303, %307 : vector<8x32xf32>
    %309 = tpu.concatenate %308, %287 in 1 : vector<8x32xf32>, vector<8x32xf32> -> vector<8x64xf32>
    %cst_57 = arith.constant dense<0.000000e+00> : vector<8x128xf32>
    %310 = tpu.matmul %309, %1, %cst_57 {dimension_numbers = #tpu.dot_dimension_numbers<[1], [0], [0], [1], [0, 0, 1, 1], [], []>} : vector<8x64xf32>, vector<64x128xf32>, vector<8x128xf32> -> vector<8x128xf32>
    %311 = arith.addf %310, %3 : vector<8x128xf32>
    %312 = vector.extract_strided_slice %311 {offsets = [0, 0], sizes = [8, 96], strides = [1, 1]} : vector<8x128xf32> to vector<8x96xf32>
    %313 = arith.negf %312 : vector<8x96xf32>
    %314 = math.exp %313 : vector<8x96xf32>
    %cst_58 = arith.constant 1.000000e+00 : f32
    %315 = vector.broadcast %cst_58 : f32 to vector<8x96xf32>
    %316 = arith.addf %315, %314 : vector<8x96xf32>
    %317 = arith.divf %315, %316 : vector<8x96xf32>
    %318 = vector.extract_strided_slice %311 {offsets = [0, 96], sizes = [8, 32], strides = [1, 1]} : vector<8x128xf32> to vector<8x32xf32>
    %319 = math.tanh %318 : vector<8x32xf32>
    %320 = vector.extract_strided_slice %317 {offsets = [0, 0], sizes = [8, 32], strides = [1, 1]} : vector<8x96xf32> to vector<8x32xf32>
    %321 = vector.extract_strided_slice %317 {offsets = [0, 32], sizes = [8, 32], strides = [1, 1]} : vector<8x96xf32> to vector<8x32xf32>
    %322 = vector.extract_strided_slice %317 {offsets = [0, 64], sizes = [8, 32], strides = [1, 1]} : vector<8x96xf32> to vector<8x32xf32>
    %323 = arith.mulf %321, %285 : vector<8x32xf32>
    %324 = arith.mulf %320, %319 : vector<8x32xf32>
    %325 = arith.addf %323, %324 : vector<8x32xf32>
    %326 = math.tanh %325 : vector<8x32xf32>
    %327 = arith.mulf %322, %326 : vector<8x32xf32>
    %c0_59 = arith.constant 0 : index
    %c0_60 = arith.constant 0 : index
    %328 = vector.load %arg5[%c0_59, %c0_60] : memref<8x32xf32, #tpu.memory_space<vmem>>, vector<8x32xf32>
    tpu.vector_store %arg5[%c0_59, %c0_60], %327 {strides = array<i32>} : memref<8x32xf32, #tpu.memory_space<vmem>>, vector<8x32xf32>,
    return
  }
}

</mosaic_0001>

<bundles_post_ra>
// kernel: tpu_custom_call.1
= control target key start
LH: loop header
LB: loop body
LE: loop exit
PB: predicated region body
PF: predicated region fallthrough
CT: control target
= control target key end

     0   :  { %10 = vsyncpa [#allocation3], 0  ;;  %s3104_s0 = inlined_call_operand.hbm [shape: f32[8,8,16], index: 0, kind: input, shape index: {}]   ;;  %s3105_s1 = inlined_call_operand.hbm [shape: f32[48,128], index: 1, kind: input, shape index: {}]   ;;  %s3106_s2 = inlined_call_operand.hbm [shape: f32[8,128], index: 2, kind: input, shape index: {}]   ;;  %s3107_s3 = inlined_call_operand.hbm [shape: f32[64,128], index: 3, kind: input, shape index: {}]   ;;  %s3108_s4 = inlined_call_operand.vmem [shape: f32[8,128], index: 4, kind: input, shape index: {}]   ;;  %s3109_s5 = inlined_call_operand.hbm [shape: f32[8,32], index: 5, kind: output, shape index: {}]  }
   0x1   :  { %11 = vsyncpa [#allocation6], 0 }
   0x2   :  { %12 = vsyncpa [#allocation9], 0 }
   0x3   :  { %13 = vsyncpa [#allocation4], 0  ;;  %s2640_s18 = smov [#allocation5]   ;;  %s2641_s20 = smov [#allocation2]  }
   0x4   :  { %s31_s19 = sshll.u32 %s2640_s18, 4  ;;  %s19_s21 = sshll.u32 %s2641_s20, 4  ;;  %s32_s19 = int_to_ptr.vmem [resolvable:$true] %s31_s19  ;;  %s2684_s21 = int_to_ptr.vmem [resolvable:$true] %s19_s21 }
   0x5   :  { %s2522_s24 = scalar_lea.hbm %s3105_s1, 768 }
   0x6   :  { %p2523_p0 = scmp.ne.s32.totalorder %s3105_s1, %s2522_s24  ;;  %p2526_p1 = scmp.lt.u32.totalorder %s2522_s24, %s3105_s1 }
   0x8   :  { %p2528_p2 = pnand %p2526_p1, %p2523_p0 }
   0xa   :  { %2531 = shalt.err (!%p2528_p2)
}
   0xb   :  { %s2532_s29 = scalar_lea.vmem %s32_s19, 768  ;;  %p2537_p4 = scmp.lt.s32.totalorder %s32_s19, %s32_s19 }
   0xc   :  { %p2533_p3 = scmp.ne.s32.totalorder %s32_s19, %s2532_s29  ;;  %p2538_p5 = scmp.lt.s32.totalorder %s2532_s29, %s2532_s29 }
   0xe   :  { %p2539_p6 = por %p2538_p5, %p2537_p4 }
  0x10   :  { %p2540_p7 = pnand %p2539_p6, %p2533_p3 }
  0x12   :  { %2543 = shalt.err (!%p2540_p7)
}
  0x13   :  { %s2642_s30 = smov 128   ;;  %s2643_s6 = smov 8  }
  0x14   :  { %37 = dma.hbm_to_vmem [thread:$0]  %s3105_s1, 768, %s32_s19, [#allocation6], %s2642_s30, %s2642_s30, %s2643_s6  }
  0x15   :  { %s2544_s11 = scalar_lea.hbm %s3104_s0, 1024 }
  0x16   :  { %p2545_p8 = scmp.ne.s32.totalorder %s3104_s0, %s2544_s11  ;;  %p2548_p9 = scmp.lt.u32.totalorder %s2544_s11, %s3104_s0 }
  0x18   :  { %p2550_p10 = pnand %p2548_p9, %p2545_p8 }
  0x1a   :  { %2553 = shalt.err (!%p2550_p10)
}
  0x1b   :  { %s2554_s16 = scalar_lea.vmem %s2684_s21, 1024  ;;  %p2559_p12 = scmp.lt.s32.totalorder %s2684_s21, %s2684_s21 }
  0x1c   :  { %p2555_p11 = scmp.ne.s32.totalorder %s2684_s21, %s2554_s16  ;;  %p2560_p13 = scmp.lt.s32.totalorder %s2554_s16, %s2554_s16 }
  0x1e   :  { %p2561_p0 = por %p2560_p13, %p2559_p12 }
  0x20   :  { %p2562_p1 = pnand %p2561_p0, %p2555_p11 }
  0x22   :  { %2565 = shalt.err (!%p2562_p1)
}
  0x23   :  { %25 = dma.hbm_to_vmem [thread:$0]  %s3104_s0, 1024, %s2684_s21, [#allocation3], %s2642_s30, %s2642_s30, %s2643_s6  }
  0x24   :  { %s2644_s18 = smov [#allocation7]   ;;  %s2645_s20 = smov [#allocation8]  }
  0x25   :  { %s44_s19 = sshll.u32 %s2644_s18, 4  ;;  %s53_s22 = sshll.u32 %s2645_s20, 4  ;;  %s45_s19 = int_to_ptr.vmem [resolvable:$true] %s44_s19  ;;  %s2721_s22 = int_to_ptr.vmem [resolvable:$true] %s53_s22 }
  0x26   :  { %s2566_s25 = scalar_lea.hbm %s3106_s2, 128 }
  0x27   :  { %p2567_p2 = scmp.ne.s32.totalorder %s3106_s2, %s2566_s25  ;;  %p2570_p3 = scmp.lt.u32.totalorder %s2566_s25, %s3106_s2 }
  0x29   :  { %p2572_p4 = pnand %p2570_p3, %p2567_p2 }
  0x2b   :  { %2575 = shalt.err (!%p2572_p4)
}
  0x2c   :  { %s2576_s0 = scalar_lea.vmem %s45_s19, 128  ;;  %p2581_p6 = scmp.lt.s32.totalorder %s45_s19, %s45_s19 }
  0x2d   :  { %p2577_p5 = scmp.ne.s32.totalorder %s45_s19, %s2576_s0  ;;  %p2582_p7 = scmp.lt.s32.totalorder %s2576_s0, %s2576_s0 }
  0x2f   :  { %p2583_p8 = por %p2582_p7, %p2581_p6 }
  0x31   :  { %p2584_p9 = pnand %p2583_p8, %p2577_p5 }
  0x33   :  { %2587 = shalt.err (!%p2584_p9)
}
  0x34   :  { %47 = dma.hbm_to_vmem [thread:$0]  %s3106_s2, 128, %s45_s19, [#allocation6]  }
  0x35   :  { %s2588_s10 = scalar_lea.hbm %s3107_s3, 1024 }
  0x36   :  { %p2589_p10 = scmp.ne.s32.totalorder %s3107_s3, %s2588_s10  ;;  %p2592_p11 = scmp.lt.u32.totalorder %s2588_s10, %s3107_s3 }
  0x38   :  { %p2594_p12 = pnand %p2592_p11, %p2589_p10 }
  0x3a   :  { %2597 = shalt.err (!%p2594_p12)
}
  0x3b   :  { %s2598_s15 = scalar_lea.vmem %s2721_s22, 1024  ;;  %p2603_p0 = scmp.lt.s32.totalorder %s2721_s22, %s2721_s22 }
  0x3c   :  { %p2599_p13 = scmp.ne.s32.totalorder %s2721_s22, %s2598_s15  ;;  %p2604_p1 = scmp.lt.s32.totalorder %s2598_s15, %s2598_s15 }
  0x3e   :  { %p2605_p2 = por %p2604_p1, %p2603_p0 }
  0x40   :  { %p2606_p3 = pnand %p2605_p2, %p2599_p13 }
  0x42   :  { %2609 = shalt.err (!%p2606_p3)
}
  0x43   :  { %59 = dma.hbm_to_vmem [thread:$0]  %s3107_s3, 1024, %s2721_s22, [#allocation9], %s2642_s30, %s2642_s30, %s2643_s6  }
  0x44   :  { %2632 = dma.done.wait [#allocation3], 1024  }
  0x45   :  { %2633 = vsyncadd [#allocation3], 4294966272 }
  0x46   :  { %2634 = dma.done.wait [#allocation6], 896  }
  0x47   :  { %2635 = vsyncadd [#allocation6], 4294966400 }
  0x48   :  { %2636 = dma.done.wait [#allocation9], 1024  }
  0x49   :  { %2637 = vsyncadd [#allocation9], 4294966272  ;;  %v2646_v0 = vmov 0.0|0.0   ;;  %vm2647_vm0 = vmmov 0   ;;  %v2648_v1 = vmov 0.0   ;;  %v74_v2 = vld [vmem:[#allocation5] sm:$0xff] }
  0x4a   :  { %2212 = vmatprep.subr.bf16.mxu1 %v2646_v0  ;;  %1952 = vmatprep.mubr.msk.f32.mxu1 %vm2647_vm0, %v2648_v1  ;;  %v75_v3 = vld [vmem:[#allocation5 + $0x8] sm:$0xff]  ;;  %v76_v4 = vld [vmem:[#allocation5 + $0x10] sm:$0xff]  ;;  %v77_v6 = vld [vmem:[#allocation5 + $0x18] sm:$0xff]  ;;  %vm91_vm1 = vcmask 130048   ;;  %vm93_vm2 = vcmask 392192   ;;  %s2649_s3 = smov 32  }
  0x4b   :  { %2233 = vmatprep.subr.bf16.mxu0 %v2646_v0  ;;  %1986 = vmatprep.mubr.msk.f32.mxu0 %vm2647_vm0, %v2648_v1  ;;  %v2761_v5 = vpack.c.bf16 %v75_v3, %v74_v2  ;;  %v2764_v7 = vpack.c.bf16 %v77_v6, %v76_v4  ;;  %v78_v8 = vld [vmem:[#allocation5 + $0x20] sm:$0xff]  ;;  %v79_v9 = vld [vmem:[#allocation5 + $0x28] sm:$0xff]  ;;  %v2783_v13 = vld [vmem:[#allocation7] sm:$0xff]  ;;  %s2650_s30 = smov 80   ;;  %s2651_s6 = smov 64   ;;  %vm195_vm3 = vcmask 261120  }
  0x4c   :  { %v2770_v10 = vpack.c.bf16 %v79_v9, %v78_v8  ;;  %v90_v11 = vld [vmem:[#allocation2] sm:$0xff]  ;;  %v80_v27 = vld [vmem:[#allocation8] sm:$0xff]  ;;  %v82_v29 = vld [vmem:[#allocation8 + $0x10] sm:$0xff]  ;;  %vm197_vm4 = vcmask 523264   ;;  %s2653_s18 = smov [#allocation10]  }
  0x4d   :  { %2214 = vmatpush3.bf16.msra.mxu1 %v2761_v5  ;;  %2235 = vmatpush3.bf16.msra.mxu0 %v2761_v5  ;;  %v92_v12 = vsel %vm91_vm1, %v90_v11, 0.0  ;;  %v81_v28 = vld [vmem:[#allocation8 + $0x8] sm:$0xff]  ;;  %v83_v31 = vld [vmem:[#allocation8 + $0x18] sm:$0xff]  ;;  %v84_v33 = vld [vmem:[#allocation8 + $0x20] sm:$0xff]  ;;  %s1769_s19 = sshll.u32 %s2653_s18, 4  ;;  %s1770_s19 = int_to_ptr.vmem [resolvable:$true] %s1769_s19 }
  0x4e   :  { %2215 = vmatprep.subr.bf16.mxu1 %v2646_v0  ;;  %2236 = vmatprep.subr.bf16.mxu0 %v2646_v0  ;;  %v2791_v30 = vpack.c.bf16 %v81_v28, %v80_v27  ;;  %v2794_v32 = vpack.c.bf16 %v83_v31, %v82_v29  ;;  %v85_v34 = vld [vmem:[#allocation8 + $0x28] sm:$0xff]  ;;  %v86_v36 = vld [vmem:[#allocation8 + $0x30] sm:$0xff]  ;;  %v87_v37 = vld [vmem:[#allocation8 + $0x38] sm:$0xff]  ;;  %s2610_s20 = scalar_lea.vmem %s1770_s19, 128  ;;  %p2615_p5 = scmp.lt.s32.totalorder %s1770_s19, %s1770_s19 }
  0x4f   :  { %v2798_v35 = vpack.c.bf16 %v85_v34, %v84_v33  ;;  %v2803_v39 = vpack.c.bf16 %v87_v37, %v86_v36  ;;  %v296_v42 = vld [vmem:[#allocation2 + $0x8] sm:$0xff]  ;;  %v2835_v47 = vld [vmem:[%s3108_s4] sm:$0xff]  ;;  %s2652_s4 = smov 96   ;;  %p2611_p4 = scmp.ne.s32.totalorder %s1770_s19, %s2610_s20 }
  0x50   :  { %p2616_p6 = scmp.lt.s32.totalorder %s2610_s20, %s2610_s20 }
  0x51   :  { %2217 = vmatpush3.bf16.msra.mxu1 %v2764_v7  ;;  %2238 = vmatpush3.bf16.msra.mxu0 %v2764_v7 }
  0x52   :  { %2218 = vmatprep.subr.bf16.mxu1 %v2646_v0  ;;  %2239 = vmatprep.subr.bf16.mxu0 %v2646_v0  ;;  %p2617_p7 = por %p2616_p6, %p2615_p5 }
  0x54   :  { %p2618_p8 = pnand %p2617_p7, %p2611_p4 }
  0x55   :  { %2220 = vmatpush3.bf16.msra.mxu1 %v2770_v10  ;;  %2241 = vmatpush3.bf16.msra.mxu0 %v2770_v10 }
  0x56   :  { %2221 = vmatprep.subr.bf16.mxu1 %v2646_v0  ;;  %2254 = vmatprep.subr.bf16.mxu0 %v2646_v0 }
  0x58   :  { %1953 = vmatmul.mubr.msk.f32.vlgmr.msra.gmra.mrb[0].mxu1 %vm93_vm2, %v92_v12 }
  0x59   :  { %1971 = vmatprep.mubr.msk.f32.mxu1 %vm2647_vm0, %v2648_v1  ;;  %2223 = vmatpush3.bf16.msra.mxu1 %v2791_v30 }
  0x5a   :  { %2224 = vmatprep.subr.bf16.mxu1 %v2646_v0 }
  0x5d   :  { %2226 = vmatpush3.bf16.msra.mxu1 %v2794_v32 }
  0x5e   :  { %2227 = vmatprep.subr.bf16.mxu1 %v2646_v0 }
  0x61   :  { %2229 = vmatpush3.bf16.msra.mxu1 %v2798_v35 }
  0x62   :  { %2230 = vmatprep.subr.bf16.mxu1 %v2646_v0 }
  0x65   :  { %2232 = vmatpush3.bf16.msra.mxu1 %v2803_v39 }
  0x66   :  { %2242 = vmatprep.subr.bf16.mxu1 %v2646_v0 }
 0x12b   :  { %v163_v14 = vpop.f32.mrb[0].mxu1 }
 0x12c   :  { %v164_v15 = vadd.f32 %v163_v14, %v2783_v13  ;;  %v1954_v16 = vpop.f32.mrb[1].mxu1 }
 0x12e   :  { %2394 = vtanh.f32 %v164_v15  ;;  %v1781_v18 = vmul.f32 -1.442695, %v164_v15 }
 0x130   :  { %2396 = vpow2.f32 %v1781_v18 }
 0x138   :  { %v2395_v17 = vpop.eup %2394 }
 0x139   :  { %176 = vrot.lane.b32.xlu0 %v2395_v17, %s2649_s3 }
 0x13a   :  { %v2397_v19 = vpop.eup %2396 }
 0x13b   :  { %v170_v20 = vadd.f32 1.0, %v2397_v19 }
 0x13d   :  { %2398 = vrcp.f32 %v170_v20 }
 0x147   :  { %v2399_v21 = vpop.eup %2398 }
 0x148   :  { %v174_v24 = vmul.f32 0.0, %v2399_v21 }
 0x1ab   :  { %v177_v22 = vpop.permute.xlu0 %176 }
 0x1ac   :  { %v179_v23 = vmul.f32 %v2399_v21, %v177_v22 }
 0x1ae   :  { %181 = vrot.lane.b32.xlu0 %v179_v23, %s2649_s3 }
 0x220   :  { %v182_v25 = vpop.permute.xlu0 %181 }
 0x221   :  { %v2788_v26 = vadd.f32 %v182_v25, %v174_v24  ;;  %v505_v25 = vld [vmem:[#allocation2 + $0x10] sm:$0xff] }
 0x223   :  { %2400 = vtanh.f32 %v2788_v26 }
 0x22d   :  { %v2401_v38 = vpop.eup %2400 }
 0x22e   :  { %187 = vrot.lane.b32.xlu1 %v2401_v38, %s2649_s3 }
 0x2a0   :  { %v188_v40 = vpop.permute.xlu1 %187 }
 0x2a1   :  { %v190_v41 = vmul.f32 %v2399_v21, %v188_v40 }
 0x2a3   :  { %297 = vrot.lane.b32.xlu0 %v190_v41, %s2650_s30  ;;  %192 = vrot.lane.b32.xlu1 %v190_v41, %s2651_s6 }
 0x315   :  { %v298_v43 = vpop.permute.xlu0 %297  ;;  %v193_v44 = vpop.permute.xlu1 %192 }
 0x316   :  { %v300_v45 = vsel %vm91_vm1, %v296_v42, %v298_v43  ;;  %v196_v46 = vsel %vm195_vm3, %v193_v44, 0.0 }
 0x317   :  { %1972 = vmatmul.mubr.msk.f32.vlgmr.msra.gmra.mrb[2].mxu1 %vm197_vm4, %v196_v46  ;;  %1987 = vmatmul.mubr.msk.f32.vlgmr.msra.gmra.mrb[0].mxu0 %vm93_vm2, %v300_v45 }
 0x318   :  { %2244 = vmatpush3.bf16.msra.mxu1 %v2791_v30  ;;  %2256 = vmatpush3.bf16.msra.mxu0 %v2761_v5 }
 0x319   :  { %2245 = vmatprep.subr.bf16.mxu1 %v2646_v0  ;;  %2257 = vmatprep.subr.bf16.mxu0 %v2646_v0 }
 0x31a   :  { %2005 = vmatprep.mubr.msk.f32.mxu1 %vm2647_vm0, %v2648_v1  ;;  %2020 = vmatprep.mubr.msk.f32.mxu0 %vm2647_vm0, %v2648_v1 }
 0x31c   :  { %2247 = vmatpush3.bf16.msra.mxu1 %v2794_v32  ;;  %2259 = vmatpush3.bf16.msra.mxu0 %v2764_v7 }
 0x31d   :  { %2248 = vmatprep.subr.bf16.mxu1 %v2646_v0  ;;  %2260 = vmatprep.subr.bf16.mxu0 %v2646_v0 }
 0x320   :  { %2250 = vmatpush3.bf16.msra.mxu1 %v2798_v35  ;;  %2262 = vmatpush3.bf16.msra.mxu0 %v2770_v10 }
 0x321   :  { %2251 = vmatprep.subr.bf16.mxu1 %v2646_v0  ;;  %2275 = vmatprep.subr.bf16.mxu0 %v2646_v0 }
 0x324   :  { %2253 = vmatpush3.bf16.msra.mxu1 %v2803_v39 }
 0x325   :  { %2263 = vmatprep.subr.bf16.mxu1 %v2646_v0 }
 0x3ea   :  { %v267_v48 = vpop.f32.mrb[2].mxu1  ;;  %v370_v49 = vpop.f32.mrb[0].mxu0 }
 0x3eb   :  { %v268_v50 = vadd.f32 %v267_v48, %v2835_v47  ;;  %v371_v51 = vadd.f32 %v370_v49, %v2783_v13  ;;  %v1973_v52 = vpop.f32.mrb[3].mxu1  ;;  %v1988_v53 = vpop.f32.mrb[1].mxu0 }
 0x3ed   :  { %2402 = vtanh.f32 %v268_v50  ;;  %v1783_v56 = vmul.f32 -1.442695, %v268_v50  ;;  %v1785_v57 = vmul.f32 -1.442695, %v371_v51 }
 0x3ee   :  { %2404 = vtanh.f32 %v371_v51 }
 0x3ef   :  { %2406 = vpow2.f32 %v1783_v56 }
 0x3f0   :  { %2408 = vpow2.f32 %v1785_v57 }
 0x3f7   :  { %v2403_v54 = vpop.eup %2402 }
 0x3f8   :  { %v2405_v55 = vpop.eup %2404  ;;  %280 = vrot.lane.b32.xlu1 %v2403_v54, %s2649_s3 }
 0x3f9   :  { %383 = vrot.lane.b32.xlu0 %v2405_v55, %s2649_s3  ;;  %v2407_v58 = vpop.eup %2406 }
 0x3fa   :  { %v2409_v59 = vpop.eup %2408  ;;  %v274_v60 = vadd.f32 1.0, %v2407_v58 }
 0x3fb   :  { %v377_v61 = vadd.f32 1.0, %v2409_v59 }
 0x3fc   :  { %2410 = vrcp.f32 %v274_v60 }
 0x3fd   :  { %2412 = vrcp.f32 %v377_v61 }
 0x406   :  { %v2411_v62 = vpop.eup %2410 }
 0x407   :  { %v2413_v2 = vpop.eup %2412  ;;  %v278_v8 = vmul.f32 0.0, %v2411_v62 }
 0x408   :  { %v381_v9 = vmul.f32 %v2413_v2, %v2788_v26 }
 0x46a   :  { %v281_v63 = vpop.permute.xlu1 %280 }
 0x46b   :  { %v384_v3 = vpop.permute.xlu0 %383  ;;  %v283_v4 = vmul.f32 %v2411_v62, %v281_v63 }
 0x46c   :  { %v386_v6 = vmul.f32 %v2413_v2, %v384_v3 }
 0x46d   :  { %285 = vrot.lane.b32.xlu1 %v283_v4, %s2649_s3 }
 0x46e   :  { %388 = vrot.lane.b32.xlu0 %v386_v6, %s2649_s3 }
 0x4df   :  { %v286_v11 = vpop.permute.xlu1 %285 }
 0x4e0   :  { %v389_v12 = vpop.permute.xlu0 %388  ;;  %v2844_v14 = vadd.f32 %v286_v11, %v278_v8  ;;  %v714_v8 = vld [vmem:[#allocation2 + $0x18] sm:$0xff] }
 0x4e1   :  { %v2846_v15 = vadd.f32 %v389_v12, %v381_v9 }
 0x4e2   :  { %2414 = vtanh.f32 %v2844_v14 }
 0x4e3   :  { %2416 = vtanh.f32 %v2846_v15 }
 0x4ec   :  { %v2415_v16 = vpop.eup %2414 }
 0x4ed   :  { %v2417_v17 = vpop.eup %2416  ;;  %291 = vrot.lane.b32.xlu1 %v2415_v16, %s2649_s3 }
 0x4ee   :  { %394 = vrot.lane.b32.xlu0 %v2417_v17, %s2649_s3 }
 0x55f   :  { %v292_v18 = vpop.permute.xlu1 %291 }
 0x560   :  { %v395_v19 = vpop.permute.xlu0 %394  ;;  %v294_v20 = vmul.f32 %v2411_v62, %v292_v18 }
 0x561   :  { %v397_v21 = vmul.f32 %v2413_v2, %v395_v19 }
 0x562   :  { %403 = vrot.lane.b32.xlu0 %v294_v20, %s2652_s4 }
 0x563   :  { %399 = vrot.lane.b32.xlu1 %v397_v21, %s2651_s6 }
 0x567   :  { %506 = vrot.lane.b32.xlu1 %v397_v21, %s2650_s30 }
 0x5d4   :  { %v404_v22 = vpop.permute.xlu0 %403 }
 0x5d5   :  { %v400_v23 = vpop.permute.xlu1 %399 }
 0x5d6   :  { %v406_v24 = vsel %vm195_vm3, %v400_v23, %v404_v22 }
 0x5d7   :  { %2006 = vmatmul.mubr.msk.f32.vlgmr.msra.gmra.mrb[4].mxu1 %vm197_vm4, %v406_v24 }
 0x5d8   :  { %2265 = vmatpush3.bf16.msra.mxu1 %v2791_v30  ;;  %2039 = vmatprep.mubr.msk.f32.mxu1 %vm2647_vm0, %v2648_v1 }
 0x5d9   :  { %v507_v26 = vpop.permute.xlu1 %506  ;;  %2266 = vmatprep.subr.bf16.mxu1 %v2646_v0 }
 0x5da   :  { %v509_v27 = vsel %vm91_vm1, %v505_v25, %v507_v26 }
 0x5db   :  { %2021 = vmatmul.mubr.msk.f32.vlgmr.msra.gmra.mrb[2].mxu0 %vm93_vm2, %v509_v27 }
 0x5dc   :  { %2268 = vmatpush3.bf16.msra.mxu1 %v2794_v32  ;;  %2277 = vmatpush3.bf16.msra.mxu0 %v2761_v5 }
 0x5dd   :  { %2269 = vmatprep.subr.bf16.mxu1 %v2646_v0  ;;  %2278 = vmatprep.subr.bf16.mxu0 %v2646_v0 }
 0x5de   :  { %2054 = vmatprep.mubr.msk.f32.mxu0 %vm2647_vm0, %v2648_v1 }
 0x5e0   :  { %2271 = vmatpush3.bf16.msra.mxu1 %v2798_v35  ;;  %2280 = vmatpush3.bf16.msra.mxu0 %v2764_v7 }
 0x5e1   :  { %2272 = vmatprep.subr.bf16.mxu1 %v2646_v0  ;;  %2281 = vmatprep.subr.bf16.mxu0 %v2646_v0 }
 0x5e4   :  { %2274 = vmatpush3.bf16.msra.mxu1 %v2803_v39  ;;  %2283 = vmatpush3.bf16.msra.mxu0 %v2770_v10 }
 0x5e5   :  { %2284 = vmatprep.subr.bf16.mxu0 %v2646_v0  ;;  %2296 = vmatprep.subr.bf16.mxu1 %v2646_v0 }
 0x6aa   :  { %v476_v28 = vpop.f32.mrb[4].mxu1 }
 0x6ab   :  { %v477_v29 = vadd.f32 %v476_v28, %v2835_v47  ;;  %v2007_v31 = vpop.f32.mrb[5].mxu1 }
 0x6ad   :  { %2418 = vtanh.f32 %v477_v29  ;;  %v1787_v40 = vmul.f32 -1.442695, %v477_v29 }
 0x6ae   :  { %v579_v33 = vpop.f32.mrb[2].mxu0 }
 0x6af   :  { %v580_v34 = vadd.f32 %v579_v33, %v2783_v13  ;;  %v2022_v36 = vpop.f32.mrb[3].mxu0 }
 0x6b1   :  { %2420 = vtanh.f32 %v580_v34  ;;  %v1789_v41 = vmul.f32 -1.442695, %v580_v34 }
 0x6b2   :  { %2422 = vpow2.f32 %v1787_v40 }
 0x6b3   :  { %2424 = vpow2.f32 %v1789_v41 }
 0x6b7   :  { %v2419_v37 = vpop.eup %2418 }
 0x6b8   :  { %489 = vrot.lane.b32.xlu0 %v2419_v37, %s2649_s3 }
 0x6bb   :  { %v2421_v38 = vpop.eup %2420 }
 0x6bc   :  { %592 = vrot.lane.b32.xlu1 %v2421_v38, %s2649_s3  ;;  %v2423_v42 = vpop.eup %2422 }
 0x6bd   :  { %v483_v43 = vadd.f32 1.0, %v2423_v42  ;;  %v2425_v44 = vpop.eup %2424 }
 0x6be   :  { %v586_v45 = vadd.f32 1.0, %v2425_v44 }
 0x6bf   :  { %2426 = vrcp.f32 %v483_v43 }
 0x6c0   :  { %2428 = vrcp.f32 %v586_v45 }
 0x6c9   :  { %v2427_v46 = vpop.eup %2426 }
 0x6ca   :  { %v2429_v50 = vpop.eup %2428  ;;  %v487_v53 = vmul.f32 %v2427_v46, %v2844_v14 }
 0x6cb   :  { %v590_v56 = vmul.f32 %v2429_v50, %v2846_v15 }
 0x72a   :  { %v490_v48 = vpop.permute.xlu0 %489 }
 0x72b   :  { %v492_v49 = vmul.f32 %v2427_v46, %v490_v48 }
 0x72d   :  { %494 = vrot.lane.b32.xlu0 %v492_v49, %s2649_s3 }
 0x72e   :  { %v593_v51 = vpop.permute.xlu1 %592 }
 0x72f   :  { %v595_v52 = vmul.f32 %v2429_v50, %v593_v51 }
 0x731   :  { %597 = vrot.lane.b32.xlu1 %v595_v52, %s2649_s3 }
 0x79f   :  { %v495_v54 = vpop.permute.xlu0 %494 }
 0x7a0   :  { %v2884_v55 = vadd.f32 %v495_v54, %v487_v53  ;;  %v923_v53 = vld [vmem:[#allocation2 + $0x20] sm:$0xff] }
 0x7a2   :  { %2430 = vtanh.f32 %v2884_v55 }
 0x7a3   :  { %v598_v57 = vpop.permute.xlu1 %597 }
 0x7a4   :  { %v2888_v58 = vadd.f32 %v598_v57, %v590_v56 }
 0x7a6   :  { %2432 = vtanh.f32 %v2888_v58 }
 0x7ac   :  { %v2431_v59 = vpop.eup %2430 }
 0x7ad   :  { %500 = vrot.lane.b32.xlu0 %v2431_v59, %s2649_s3 }
 0x7b0   :  { %v2433_v60 = vpop.eup %2432 }
 0x7b1   :  { %603 = vrot.lane.b32.xlu1 %v2433_v60, %s2649_s3 }
 0x81f   :  { %v501_v61 = vpop.permute.xlu0 %500 }
 0x820   :  { %v503_v62 = vmul.f32 %v2427_v46, %v501_v61 }
 0x822   :  { %612 = vrot.lane.b32.xlu1 %v503_v62, %s2652_s4 }
 0x823   :  { %v604_v63 = vpop.permute.xlu1 %603 }
 0x824   :  { %v606_v2 = vmul.f32 %v2429_v50, %v604_v63 }
 0x826   :  { %608 = vrot.lane.b32.xlu0 %v606_v2, %s2651_s6 }
 0x82a   :  { %715 = vrot.lane.b32.xlu0 %v606_v2, %s2650_s30 }
 0x894   :  { %v613_v3 = vpop.permute.xlu1 %612 }
 0x898   :  { %v609_v4 = vpop.permute.xlu0 %608 }
 0x899   :  { %v615_v6 = vsel %vm195_vm3, %v609_v4, %v613_v3 }
 0x89a   :  { %2040 = vmatmul.mubr.msk.f32.vlgmr.msra.gmra.mrb[6].mxu1 %vm197_vm4, %v615_v6 }
 0x89b   :  { %2298 = vmatpush3.bf16.msra.mxu1 %v2761_v5  ;;  %2088 = vmatprep.mubr.msk.f32.mxu1 %vm2647_vm0, %v2648_v1 }
 0x89c   :  { %v716_v9 = vpop.permute.xlu0 %715  ;;  %2299 = vmatprep.subr.bf16.mxu1 %v2646_v0 }
 0x89d   :  { %v718_v11 = vsel %vm91_vm1, %v714_v8, %v716_v9 }
 0x89e   :  { %2055 = vmatmul.mubr.msk.f32.vlgmr.msra.gmra.mrb[4].mxu0 %vm93_vm2, %v718_v11 }
 0x89f   :  { %2286 = vmatpush3.bf16.msra.mxu0 %v2791_v30  ;;  %2301 = vmatpush3.bf16.msra.mxu1 %v2764_v7 }
 0x8a0   :  { %2287 = vmatprep.subr.bf16.mxu0 %v2646_v0  ;;  %2073 = vmatprep.mubr.msk.f32.mxu0 %vm2647_vm0, %v2648_v1 }
 0x8a1   :  { %2302 = vmatprep.subr.bf16.mxu1 %v2646_v0 }
 0x8a3   :  { %2289 = vmatpush3.bf16.msra.mxu0 %v2794_v32  ;;  %2304 = vmatpush3.bf16.msra.mxu1 %v2770_v10 }
 0x8a4   :  { %2290 = vmatprep.subr.bf16.mxu0 %v2646_v0  ;;  %2305 = vmatprep.subr.bf16.mxu1 %v2646_v0 }
 0x8a7   :  { %2292 = vmatpush3.bf16.msra.mxu0 %v2798_v35 }
 0x8a8   :  { %2293 = vmatprep.subr.bf16.mxu0 %v2646_v0 }
 0x8ab   :  { %2295 = vmatpush3.bf16.msra.mxu0 %v2803_v39 }
 0x8ac   :  { %2317 = vmatprep.subr.bf16.mxu0 %v2646_v0 }
 0x96d   :  { %v685_v12 = vpop.f32.mrb[6].mxu1 }
 0x96e   :  { %v686_v14 = vadd.f32 %v685_v12, %v2835_v47  ;;  %v2041_v15 = vpop.f32.mrb[7].mxu1 }
 0x970   :  { %2434 = vtanh.f32 %v686_v14  ;;  %v1791_v21 = vmul.f32 -1.442695, %v686_v14 }
 0x971   :  { %v788_v16 = vpop.f32.mrb[4].mxu0 }
 0x972   :  { %v789_v17 = vadd.f32 %v788_v16, %v2783_v13  ;;  %v2056_v18 = vpop.f32.mrb[5].mxu0 }
 0x974   :  { %2436 = vtanh.f32 %v789_v17  ;;  %v1793_v22 = vmul.f32 -1.442695, %v789_v17 }
 0x975   :  { %2438 = vpow2.f32 %v1791_v21 }
 0x976   :  { %2440 = vpow2.f32 %v1793_v22 }
 0x97a   :  { %v2435_v19 = vpop.eup %2434 }
 0x97b   :  { %698 = vrot.lane.b32.xlu1 %v2435_v19, %s2649_s3 }
 0x97e   :  { %v2437_v20 = vpop.eup %2436 }
 0x97f   :  { %801 = vrot.lane.b32.xlu0 %v2437_v20, %s2649_s3  ;;  %v2439_v23 = vpop.eup %2438 }
 0x980   :  { %v692_v24 = vadd.f32 1.0, %v2439_v23  ;;  %v2441_v25 = vpop.eup %2440 }
 0x981   :  { %v795_v26 = vadd.f32 1.0, %v2441_v25 }
 0x982   :  { %2442 = vrcp.f32 %v692_v24 }
 0x983   :  { %2444 = vrcp.f32 %v795_v26 }
 0x98c   :  { %v2443_v27 = vpop.eup %2442 }
 0x98d   :  { %v2445_v31 = vpop.eup %2444  ;;  %v696_v36 = vmul.f32 %v2443_v27, %v2884_v55 }
 0x98e   :  { %v799_v40 = vmul.f32 %v2445_v31, %v2888_v58 }
 0x9ed   :  { %v699_v28 = vpop.permute.xlu1 %698 }
 0x9ee   :  { %v701_v29 = vmul.f32 %v2443_v27, %v699_v28 }
 0x9f0   :  { %703 = vrot.lane.b32.xlu1 %v701_v29, %s2649_s3 }
 0x9f1   :  { %v802_v33 = vpop.permute.xlu0 %801 }
 0x9f2   :  { %v804_v34 = vmul.f32 %v2445_v31, %v802_v33 }
 0x9f4   :  { %806 = vrot.lane.b32.xlu0 %v804_v34, %s2649_s3 }
 0xa62   :  { %v704_v37 = vpop.permute.xlu1 %703 }
 0xa63   :  { %v2925_v38 = vadd.f32 %v704_v37, %v696_v36  ;;  %v1132_v36 = vld [vmem:[#allocation2 + $0x28] sm:$0xff] }
 0xa65   :  { %2446 = vtanh.f32 %v2925_v38 }
 0xa66   :  { %v807_v41 = vpop.permute.xlu0 %806 }
 0xa67   :  { %v2929_v42 = vadd.f32 %v807_v41, %v799_v40 }
 0xa69   :  { %2448 = vtanh.f32 %v2929_v42 }
 0xa6f   :  { %v2447_v43 = vpop.eup %2446 }
 0xa70   :  { %709 = vrot.lane.b32.xlu1 %v2447_v43, %s2649_s3 }
 0xa73   :  { %v2449_v44 = vpop.eup %2448 }
 0xa74   :  { %812 = vrot.lane.b32.xlu0 %v2449_v44, %s2649_s3 }
 0xae2   :  { %v710_v45 = vpop.permute.xlu1 %709 }
 0xae3   :  { %v712_v46 = vmul.f32 %v2443_v27, %v710_v45 }
 0xae5   :  { %821 = vrot.lane.b32.xlu0 %v712_v46, %s2652_s4 }
 0xae6   :  { %v813_v48 = vpop.permute.xlu0 %812 }
 0xae7   :  { %v815_v49 = vmul.f32 %v2445_v31, %v813_v48 }
 0xae9   :  { %817 = vrot.lane.b32.xlu1 %v815_v49, %s2651_s6 }
 0xaed   :  { %924 = vrot.lane.b32.xlu1 %v815_v49, %s2650_s30 }
 0xb57   :  { %v822_v50 = vpop.permute.xlu0 %821 }
 0xb5b   :  { %v818_v51 = vpop.permute.xlu1 %817 }
 0xb5c   :  { %v824_v52 = vsel %vm195_vm3, %v818_v51, %v822_v50 }
 0xb5d   :  { %2074 = vmatmul.mubr.msk.f32.vlgmr.msra.gmra.mrb[6].mxu0 %vm197_vm4, %v824_v52 }
 0xb5e   :  { %2319 = vmatpush3.bf16.msra.mxu0 %v2761_v5  ;;  %2122 = vmatprep.mubr.msk.f32.mxu0 %vm2647_vm0, %v2648_v1 }
 0xb5f   :  { %v925_v54 = vpop.permute.xlu1 %924  ;;  %2320 = vmatprep.subr.bf16.mxu0 %v2646_v0 }
 0xb60   :  { %v927_v55 = vsel %vm91_vm1, %v923_v53, %v925_v54 }
 0xb61   :  { %2089 = vmatmul.mubr.msk.f32.vlgmr.msra.gmra.mrb[8].mxu1 %vm93_vm2, %v927_v55 }
 0xb62   :  { %2307 = vmatpush3.bf16.msra.mxu1 %v2791_v30  ;;  %2322 = vmatpush3.bf16.msra.mxu0 %v2764_v7 }
 0xb63   :  { %2308 = vmatprep.subr.bf16.mxu1 %v2646_v0  ;;  %2107 = vmatprep.mubr.msk.f32.mxu1 %vm2647_vm0, %v2648_v1 }
 0xb64   :  { %2323 = vmatprep.subr.bf16.mxu0 %v2646_v0 }
 0xb66   :  { %2310 = vmatpush3.bf16.msra.mxu1 %v2794_v32  ;;  %2325 = vmatpush3.bf16.msra.mxu0 %v2770_v10 }
 0xb67   :  { %2311 = vmatprep.subr.bf16.mxu1 %v2646_v0  ;;  %2326 = vmatprep.subr.bf16.mxu0 %v2646_v0 }
 0xb6a   :  { %2313 = vmatpush3.bf16.msra.mxu1 %v2798_v35 }
 0xb6b   :  { %2314 = vmatprep.subr.bf16.mxu1 %v2646_v0 }
 0xb6e   :  { %2316 = vmatpush3.bf16.msra.mxu1 %v2803_v39 }
 0xb6f   :  { %2338 = vmatprep.subr.bf16.mxu1 %v2646_v0 }
 0xc30   :  { %v894_v56 = vpop.f32.mrb[6].mxu0 }
 0xc31   :  { %v895_v57 = vadd.f32 %v894_v56, %v2835_v47  ;;  %v2075_v58 = vpop.f32.mrb[7].mxu0 }
 0xc33   :  { %2450 = vtanh.f32 %v895_v57  ;;  %v1795_v2 = vmul.f32 -1.442695, %v895_v57 }
 0xc34   :  { %v997_v59 = vpop.f32.mrb[8].mxu1 }
 0xc35   :  { %v998_v60 = vadd.f32 %v997_v59, %v2783_v13  ;;  %v2090_v61 = vpop.f32.mrb[9].mxu1 }
 0xc37   :  { %2452 = vtanh.f32 %v998_v60  ;;  %v1797_v3 = vmul.f32 -1.442695, %v998_v60 }
 0xc38   :  { %2454 = vpow2.f32 %v1795_v2 }
 0xc39   :  { %2456 = vpow2.f32 %v1797_v3 }
 0xc3d   :  { %v2451_v62 = vpop.eup %2450 }
 0xc3e   :  { %907 = vrot.lane.b32.xlu0 %v2451_v62, %s2649_s3 }
 0xc41   :  { %v2453_v63 = vpop.eup %2452 }
 0xc42   :  { %1010 = vrot.lane.b32.xlu1 %v2453_v63, %s2649_s3  ;;  %v2455_v4 = vpop.eup %2454 }
 0xc43   :  { %v901_v6 = vadd.f32 1.0, %v2455_v4  ;;  %v2457_v8 = vpop.eup %2456 }
 0xc44   :  { %v1004_v9 = vadd.f32 1.0, %v2457_v8 }
 0xc45   :  { %2458 = vrcp.f32 %v901_v6 }
 0xc46   :  { %2460 = vrcp.f32 %v1004_v9 }
 0xc4f   :  { %v2459_v11 = vpop.eup %2458 }
 0xc50   :  { %v2461_v15 = vpop.eup %2460  ;;  %v905_v18 = vmul.f32 %v2459_v11, %v2925_v38 }
 0xc51   :  { %v1008_v21 = vmul.f32 %v2461_v15, %v2929_v42 }
 0xcb0   :  { %v908_v12 = vpop.permute.xlu0 %907 }
 0xcb1   :  { %v910_v14 = vmul.f32 %v2459_v11, %v908_v12 }
 0xcb3   :  { %912 = vrot.lane.b32.xlu0 %v910_v14, %s2649_s3 }
 0xcb4   :  { %v1011_v16 = vpop.permute.xlu1 %1010 }
 0xcb5   :  { %v1013_v17 = vmul.f32 %v2461_v15, %v1011_v16 }
 0xcb7   :  { %1015 = vrot.lane.b32.xlu1 %v1013_v17, %s2649_s3 }
 0xd25   :  { %v913_v19 = vpop.permute.xlu0 %912 }
 0xd26   :  { %v2966_v20 = vadd.f32 %v913_v19, %v905_v18  ;;  %v1341_v18 = vld [vmem:[#allocation2 + $0x30] sm:$0xff] }
 0xd28   :  { %2462 = vtanh.f32 %v2966_v20 }
 0xd29   :  { %v1016_v22 = vpop.permute.xlu1 %1015 }
 0xd2a   :  { %v2970_v23 = vadd.f32 %v1016_v22, %v1008_v21 }
 0xd2c   :  { %2464 = vtanh.f32 %v2970_v23 }
 0xd32   :  { %v2463_v24 = vpop.eup %2462 }
 0xd33   :  { %918 = vrot.lane.b32.xlu0 %v2463_v24, %s2649_s3 }
 0xd36   :  { %v2465_v25 = vpop.eup %2464 }
 0xd37   :  { %1021 = vrot.lane.b32.xlu1 %v2465_v25, %s2649_s3 }
 0xda5   :  { %v919_v26 = vpop.permute.xlu0 %918 }
 0xda6   :  { %v921_v27 = vmul.f32 %v2459_v11, %v919_v26 }
 0xda8   :  { %1030 = vrot.lane.b32.xlu1 %v921_v27, %s2652_s4 }
 0xda9   :  { %v1022_v28 = vpop.permute.xlu1 %1021 }
 0xdaa   :  { %v1024_v29 = vmul.f32 %v2461_v15, %v1022_v28 }
 0xdac   :  { %1026 = vrot.lane.b32.xlu0 %v1024_v29, %s2651_s6 }
 0xdb0   :  { %1133 = vrot.lane.b32.xlu0 %v1024_v29, %s2650_s30 }
 0xe1a   :  { %v1031_v31 = vpop.permute.xlu1 %1030 }
 0xe1e   :  { %v1027_v33 = vpop.permute.xlu0 %1026 }
 0xe1f   :  { %v1033_v34 = vsel %vm195_vm3, %v1027_v33, %v1031_v31 }
 0xe20   :  { %2108 = vmatmul.mubr.msk.f32.vlgmr.msra.gmra.mrb[10].mxu1 %vm197_vm4, %v1033_v34 }
 0xe21   :  { %2340 = vmatpush3.bf16.msra.mxu1 %v2761_v5  ;;  %2156 = vmatprep.mubr.msk.f32.mxu1 %vm2647_vm0, %v2648_v1 }
 0xe22   :  { %v1134_v37 = vpop.permute.xlu0 %1133  ;;  %2341 = vmatprep.subr.bf16.mxu1 %v2646_v0 }
 0xe23   :  { %v1136_v38 = vsel %vm91_vm1, %v1132_v36, %v1134_v37 }
 0xe24   :  { %2123 = vmatmul.mubr.msk.f32.vlgmr.msra.gmra.mrb[8].mxu0 %vm93_vm2, %v1136_v38 }
 0xe25   :  { %2328 = vmatpush3.bf16.msra.mxu0 %v2791_v30  ;;  %2343 = vmatpush3.bf16.msra.mxu1 %v2764_v7 }
 0xe26   :  { %2329 = vmatprep.subr.bf16.mxu0 %v2646_v0  ;;  %2141 = vmatprep.mubr.msk.f32.mxu0 %vm2647_vm0, %v2648_v1 }
 0xe27   :  { %2344 = vmatprep.subr.bf16.mxu1 %v2646_v0 }
 0xe29   :  { %2331 = vmatpush3.bf16.msra.mxu0 %v2794_v32  ;;  %2346 = vmatpush3.bf16.msra.mxu1 %v2770_v10 }
 0xe2a   :  { %2332 = vmatprep.subr.bf16.mxu0 %v2646_v0  ;;  %2347 = vmatprep.subr.bf16.mxu1 %v2646_v0 }
 0xe2d   :  { %2334 = vmatpush3.bf16.msra.mxu0 %v2798_v35 }
 0xe2e   :  { %2335 = vmatprep.subr.bf16.mxu0 %v2646_v0 }
 0xe31   :  { %2337 = vmatpush3.bf16.msra.mxu0 %v2803_v39 }
 0xe32   :  { %2359 = vmatprep.subr.bf16.mxu0 %v2646_v0 }
 0xef3   :  { %v1103_v40 = vpop.f32.mrb[10].mxu1 }
 0xef4   :  { %v1104_v41 = vadd.f32 %v1103_v40, %v2835_v47  ;;  %v2109_v42 = vpop.f32.mrb[11].mxu1 }
 0xef6   :  { %2466 = vtanh.f32 %v1104_v41  ;;  %v1799_v49 = vmul.f32 -1.442695, %v1104_v41 }
 0xef7   :  { %v1206_v43 = vpop.f32.mrb[8].mxu0 }
 0xef8   :  { %v1207_v44 = vadd.f32 %v1206_v43, %v2783_v13  ;;  %v2124_v45 = vpop.f32.mrb[9].mxu0 }
 0xefa   :  { %2468 = vtanh.f32 %v1207_v44  ;;  %v1801_v50 = vmul.f32 -1.442695, %v1207_v44 }
 0xefb   :  { %2470 = vpow2.f32 %v1799_v49 }
 0xefc   :  { %2472 = vpow2.f32 %v1801_v50 }
 0xf00   :  { %v2467_v46 = vpop.eup %2466 }
 0xf01   :  { %1116 = vrot.lane.b32.xlu1 %v2467_v46, %s2649_s3 }
 0xf04   :  { %v2469_v48 = vpop.eup %2468 }
 0xf05   :  { %1219 = vrot.lane.b32.xlu0 %v2469_v48, %s2649_s3  ;;  %v2471_v51 = vpop.eup %2470 }
 0xf06   :  { %v1110_v52 = vadd.f32 1.0, %v2471_v51  ;;  %v2473_v53 = vpop.eup %2472 }
 0xf07   :  { %v1213_v54 = vadd.f32 1.0, %v2473_v53 }
 0xf08   :  { %2474 = vrcp.f32 %v1110_v52 }
 0xf09   :  { %2476 = vrcp.f32 %v1213_v54 }
 0xf12   :  { %v2475_v55 = vpop.eup %2474 }
 0xf13   :  { %v2477_v58 = vpop.eup %2476  ;;  %v1114_v61 = vmul.f32 %v2475_v55, %v2966_v20 }
 0xf14   :  { %v1217_v2 = vmul.f32 %v2477_v58, %v2970_v23 }
 0xf73   :  { %v1117_v56 = vpop.permute.xlu1 %1116 }
 0xf74   :  { %v1119_v57 = vmul.f32 %v2475_v55, %v1117_v56 }
 0xf76   :  { %1121 = vrot.lane.b32.xlu1 %v1119_v57, %s2649_s3 }
 0xf77   :  { %v1220_v59 = vpop.permute.xlu0 %1219 }
 0xf78   :  { %v1222_v60 = vmul.f32 %v2477_v58, %v1220_v59 }
 0xf7a   :  { %1224 = vrot.lane.b32.xlu0 %v1222_v60, %s2649_s3 }
 0xfe8   :  { %v1122_v62 = vpop.permute.xlu1 %1121 }
 0xfe9   :  { %v3007_v63 = vadd.f32 %v1122_v62, %v1114_v61 }
 0xfeb   :  { %2478 = vtanh.f32 %v3007_v63 }
 0xfec   :  { %v1225_v3 = vpop.permute.xlu0 %1224 }
 0xfed   :  { %v3011_v4 = vadd.f32 %v1225_v3, %v1217_v2 }
 0xfef   :  { %2480 = vtanh.f32 %v3011_v4 }
 0xff5   :  { %v2479_v6 = vpop.eup %2478 }
 0xff6   :  { %1127 = vrot.lane.b32.xlu1 %v2479_v6, %s2649_s3 }
 0xff9   :  { %v2481_v8 = vpop.eup %2480 }
 0xffa   :  { %1230 = vrot.lane.b32.xlu0 %v2481_v8, %s2649_s3 }
0x1068   :  { %v1128_v9 = vpop.permute.xlu1 %1127 }
0x1069   :  { %v1130_v11 = vmul.f32 %v2475_v55, %v1128_v9 }
0x106b   :  { %1239 = vrot.lane.b32.xlu0 %v1130_v11, %s2652_s4 }
0x106c   :  { %v1231_v12 = vpop.permute.xlu0 %1230 }
0x106d   :  { %v1233_v14 = vmul.f32 %v2477_v58, %v1231_v12  ;;  %v1550_v58 = vld [vmem:[#allocation2 + $0x38] sm:$0xff] }
0x106f   :  { %1235 = vrot.lane.b32.xlu1 %v1233_v14, %s2651_s6 }
0x1073   :  { %1342 = vrot.lane.b32.xlu1 %v1233_v14, %s2650_s30 }
0x10dd   :  { %v1240_v15 = vpop.permute.xlu0 %1239 }
0x10e1   :  { %v1236_v16 = vpop.permute.xlu1 %1235 }
0x10e2   :  { %v1242_v17 = vsel %vm195_vm3, %v1236_v16, %v1240_v15 }
0x10e3   :  { %2142 = vmatmul.mubr.msk.f32.vlgmr.msra.gmra.mrb[10].mxu0 %vm197_vm4, %v1242_v17 }
0x10e4   :  { %2361 = vmatpush3.bf16.msra.mxu0 %v2761_v5  ;;  %2190 = vmatprep.mubr.msk.f32.mxu0 %vm2647_vm0, %v2648_v1 }
0x10e5   :  { %v1343_v19 = vpop.permute.xlu1 %1342  ;;  %2362 = vmatprep.subr.bf16.mxu0 %v2646_v0 }
0x10e6   :  { %v1345_v20 = vsel %vm91_vm1, %v1341_v18, %v1343_v19 }
0x10e7   :  { %2157 = vmatmul.mubr.msk.f32.vlgmr.msra.gmra.mrb[12].mxu1 %vm93_vm2, %v1345_v20 }
0x10e8   :  { %2349 = vmatpush3.bf16.msra.mxu1 %v2791_v30  ;;  %2364 = vmatpush3.bf16.msra.mxu0 %v2764_v7 }
0x10e9   :  { %2350 = vmatprep.subr.bf16.mxu1 %v2646_v0  ;;  %2175 = vmatprep.mubr.msk.f32.mxu1 %vm2647_vm0, %v2648_v1 }
0x10ea   :  { %2365 = vmatprep.subr.bf16.mxu0 %v2646_v0 }
0x10ec   :  { %2352 = vmatpush3.bf16.msra.mxu1 %v2794_v32  ;;  %2367 = vmatpush3.bf16.msra.mxu0 %v2770_v10 }
0x10ed   :  { %2353 = vmatprep.subr.bf16.mxu1 %v2646_v0  ;;  %2368 = vmatprep.subr.bf16.mxu0 %v2646_v0 }
0x10f0   :  { %2355 = vmatpush3.bf16.msra.mxu1 %v2798_v35 }
0x10f1   :  { %2356 = vmatprep.subr.bf16.mxu1 %v2646_v0 }
0x10f4   :  { %2358 = vmatpush3.bf16.msra.mxu1 %v2803_v39 }
0x11b6   :  { %v1312_v5 = vpop.f32.mrb[10].mxu0 }
0x11b7   :  { %v1313_v7 = vadd.f32 %v1312_v5, %v2835_v47  ;;  %v2143_v21 = vpop.f32.mrb[11].mxu0 }
0x11b9   :  { %2482 = vtanh.f32 %v1313_v7  ;;  %v1803_v26 = vmul.f32 -1.442695, %v1313_v7 }
0x11ba   :  { %v1415_v22 = vpop.f32.mrb[12].mxu1 }
0x11bb   :  { %v1416_v23 = vadd.f32 %v1415_v22, %v2783_v13  ;;  %v2158_v24 = vpop.f32.mrb[13].mxu1 }
0x11bd   :  { %2484 = vtanh.f32 %v1416_v23  ;;  %v1805_v27 = vmul.f32 -1.442695, %v1416_v23 }
0x11be   :  { %2486 = vpow2.f32 %v1803_v26 }
0x11bf   :  { %2488 = vpow2.f32 %v1805_v27 }
0x11c3   :  { %v2483_v10 = vpop.eup %2482 }
0x11c4   :  { %1325 = vrot.lane.b32.xlu0 %v2483_v10, %s2649_s3 }
0x11c7   :  { %v2485_v25 = vpop.eup %2484 }
0x11c8   :  { %1428 = vrot.lane.b32.xlu1 %v2485_v25, %s2649_s3  ;;  %v2487_v28 = vpop.eup %2486 }
0x11c9   :  { %v1319_v29 = vadd.f32 1.0, %v2487_v28  ;;  %v2489_v31 = vpop.eup %2488 }
0x11ca   :  { %v1422_v33 = vadd.f32 1.0, %v2489_v31 }
0x11cb   :  { %2490 = vrcp.f32 %v1319_v29 }
0x11cc   :  { %2492 = vrcp.f32 %v1422_v33 }
0x11d5   :  { %v2491_v34 = vpop.eup %2490 }
0x11d6   :  { %v2493_v38 = vpop.eup %2492  ;;  %v1323_v42 = vmul.f32 %v2491_v34, %v3007_v63 }
0x11d7   :  { %v1426_v45 = vmul.f32 %v2493_v38, %v3011_v4 }
0x1236   :  { %v1326_v36 = vpop.permute.xlu0 %1325 }
0x1237   :  { %v1328_v37 = vmul.f32 %v2491_v34, %v1326_v36 }
0x1239   :  { %1330 = vrot.lane.b32.xlu0 %v1328_v37, %s2649_s3 }
0x123a   :  { %v1429_v40 = vpop.permute.xlu1 %1428 }
0x123b   :  { %v1431_v41 = vmul.f32 %v2493_v38, %v1429_v40 }
0x123d   :  { %1433 = vrot.lane.b32.xlu1 %v1431_v41, %s2649_s3 }
0x12ab   :  { %v1331_v43 = vpop.permute.xlu0 %1330 }
0x12ac   :  { %v3047_v44 = vadd.f32 %v1331_v43, %v1323_v42 }
0x12ae   :  { %2494 = vtanh.f32 %v3047_v44 }
0x12af   :  { %v1434_v46 = vpop.permute.xlu1 %1433 }
0x12b0   :  { %v3051_v48 = vadd.f32 %v1434_v46, %v1426_v45 }
0x12b2   :  { %2496 = vtanh.f32 %v3051_v48 }
0x12b8   :  { %v2495_v49 = vpop.eup %2494 }
0x12b9   :  { %1336 = vrot.lane.b32.xlu0 %v2495_v49, %s2649_s3 }
0x12bc   :  { %v2497_v50 = vpop.eup %2496 }
0x12bd   :  { %1439 = vrot.lane.b32.xlu1 %v2497_v50, %s2649_s3 }
0x132b   :  { %v1337_v51 = vpop.permute.xlu0 %1336 }
0x132c   :  { %v1339_v52 = vmul.f32 %v2491_v34, %v1337_v51 }
0x132e   :  { %1448 = vrot.lane.b32.xlu1 %v1339_v52, %s2652_s4 }
0x132f   :  { %v1440_v53 = vpop.permute.xlu1 %1439 }
0x1330   :  { %v1442_v54 = vmul.f32 %v2493_v38, %v1440_v53 }
0x1332   :  { %1444 = vrot.lane.b32.xlu0 %v1442_v54, %s2651_s6 }
0x1336   :  { %1551 = vrot.lane.b32.xlu0 %v1442_v54, %s2650_s30 }
0x13a0   :  { %v1449_v55 = vpop.permute.xlu1 %1448 }
0x13a4   :  { %v1445_v56 = vpop.permute.xlu0 %1444 }
0x13a5   :  { %v1451_v57 = vsel %vm195_vm3, %v1445_v56, %v1449_v55 }
0x13a6   :  { %2176 = vmatmul.mubr.msk.f32.vlgmr.msra.gmra.mrb[14].mxu1 %vm197_vm4, %v1451_v57 }
0x13a8   :  { %v1552_v59 = vpop.permute.xlu0 %1551 }
0x13a9   :  { %v1554_v60 = vsel %vm91_vm1, %v1550_v58, %v1552_v59 }
0x13aa   :  { %2191 = vmatmul.mubr.msk.f32.vlgmr.msra.gmra.mrb[12].mxu0 %vm93_vm2, %v1554_v60 }
0x13ab   :  { %2370 = vmatpush3.bf16.msra.mxu0 %v2791_v30  ;;  %2209 = vmatprep.mubr.msk.f32.mxu0 %vm2647_vm0, %v2648_v1 }
0x13ac   :  { %2371 = vmatprep.subr.bf16.mxu0 %v2646_v0 }
0x13af   :  { %2373 = vmatpush3.bf16.msra.mxu0 %v2794_v32 }
0x13b0   :  { %2374 = vmatprep.subr.bf16.mxu0 %v2646_v0 }
0x13b3   :  { %2376 = vmatpush3.bf16.msra.mxu0 %v2798_v35 }
0x13b4   :  { %2377 = vmatprep.subr.bf16.mxu0 %v2646_v0 }
0x13b7   :  { %2379 = vmatpush3.bf16.msra.mxu0 %v2803_v39 }
0x1479   :  { %v1521_v61 = vpop.f32.mrb[14].mxu1 }
0x147a   :  { %v1522_v62 = vadd.f32 %v1521_v61, %v2835_v47  ;;  %v2177_v63 = vpop.f32.mrb[15].mxu1 }
0x147c   :  { %2498 = vtanh.f32 %v1522_v62  ;;  %v1807_v35 = vmul.f32 -1.442695, %v1522_v62 }
0x147d   :  { %v1624_v30 = vpop.f32.mrb[12].mxu0 }
0x147e   :  { %v1625_v1 = vadd.f32 %v1624_v30, %v2783_v13  ;;  %v2192_v2 = vpop.f32.mrb[13].mxu0 }
0x1480   :  { %2500 = vtanh.f32 %v1625_v1  ;;  %v1809_v0 = vmul.f32 -1.442695, %v1625_v1 }
0x1481   :  { %2502 = vpow2.f32 %v1807_v35 }
0x1482   :  { %2504 = vpow2.f32 %v1809_v0 }
0x1486   :  { %v2499_v3 = vpop.eup %2498 }
0x1487   :  { %1534 = vrot.lane.b32.xlu1 %v2499_v3, %s2649_s3 }
0x148a   :  { %v2501_v32 = vpop.eup %2500 }
0x148b   :  { %1637 = vrot.lane.b32.xlu0 %v2501_v32, %s2649_s3  ;;  %v2503_v39 = vpop.eup %2502 }
0x148c   :  { %v1528_v4 = vadd.f32 1.0, %v2503_v39  ;;  %v2505_v6 = vpop.eup %2504 }
0x148d   :  { %v1631_v8 = vadd.f32 1.0, %v2505_v6 }
0x148e   :  { %2506 = vrcp.f32 %v1528_v4 }
0x148f   :  { %2508 = vrcp.f32 %v1631_v8 }
0x1498   :  { %v2507_v9 = vpop.eup %2506 }
0x1499   :  { %v2509_v12 = vpop.eup %2508  ;;  %v1532_v16 = vmul.f32 %v2507_v9, %v3047_v44 }
0x149a   :  { %v1635_v19 = vmul.f32 %v2509_v12, %v3051_v48 }
0x14f9   :  { %v1535_v13 = vpop.permute.xlu1 %1534 }
0x14fa   :  { %v1537_v11 = vmul.f32 %v2507_v9, %v1535_v13 }
0x14fc   :  { %1539 = vrot.lane.b32.xlu1 %v1537_v11, %s2649_s3 }
0x14fd   :  { %v1638_v14 = vpop.permute.xlu0 %1637 }
0x14fe   :  { %v1640_v15 = vmul.f32 %v2509_v12, %v1638_v14 }
0x1500   :  { %1642 = vrot.lane.b32.xlu0 %v1640_v15, %s2649_s3 }
0x156e   :  { %v1540_v17 = vpop.permute.xlu1 %1539 }
0x156f   :  { %v1542_v18 = vadd.f32 %v1540_v17, %v1532_v16 }
0x1571   :  { %2510 = vtanh.f32 %v1542_v18 }
0x1572   :  { %v1643_v20 = vpop.permute.xlu0 %1642 }
0x1573   :  { %v1645_v5 = vadd.f32 %v1643_v20, %v1635_v19 }
0x1575   :  { %2512 = vtanh.f32 %v1645_v5 }
0x157b   :  { %v2511_v7 = vpop.eup %2510 }
0x157c   :  { %1545 = vrot.lane.b32.xlu1 %v2511_v7, %s2649_s3 }
0x157f   :  { %v2513_v21 = vpop.eup %2512 }
0x1580   :  { %1648 = vrot.lane.b32.xlu0 %v2513_v21, %s2649_s3 }
0x15ee   :  { %v1546_v22 = vpop.permute.xlu1 %1545 }
0x15ef   :  { %v1548_v23 = vmul.f32 %v2507_v9, %v1546_v22 }
0x15f1   :  { %1657 = vrot.lane.b32.xlu0 %v1548_v23, %s2652_s4 }
0x15f2   :  { %v1649_v24 = vpop.permute.xlu0 %1648 }
0x15f3   :  { %v1651_v10 = vmul.f32 %v2509_v12, %v1649_v24 }
0x15f5   :  { %1653 = vrot.lane.b32.xlu1 %v1651_v10, %s2651_s6 }
0x1663   :  { %v1658_v25 = vpop.permute.xlu0 %1657 }
0x1667   :  { %v1654_v26 = vpop.permute.xlu1 %1653 }
0x1668   :  { %v1660_v27 = vsel %vm195_vm3, %v1654_v26, %v1658_v25 }
0x1669   :  { %2210 = vmatmul.mubr.msk.f32.vlgmr.msra.gmra.mrb[14].mxu0 %vm197_vm4, %v1660_v27 }
0x173c   :  { %v1730_v28 = vpop.f32.mrb[14].mxu0 }
0x173d   :  { %v1731_v29 = vadd.f32 %v1730_v28, %v2835_v47  ;;  %v2211_v31 = vpop.f32.mrb[15].mxu0 }
0x173f   :  { %2514 = vtanh.f32 %v1731_v29  ;;  %v1811_v34 = vmul.f32 -1.442695, %v1731_v29 }
0x1741   :  { %2516 = vpow2.f32 %v1811_v34 }
0x1749   :  { %v2515_v33 = vpop.eup %2514 }
0x174a   :  { %1743 = vrot.lane.b32.xlu1 %v2515_v33, %s2649_s3 }
0x174b   :  { %v2517_v36 = vpop.eup %2516 }
0x174c   :  { %v1737_v37 = vadd.f32 1.0, %v2517_v36 }
0x174e   :  { %2518 = vrcp.f32 %v1737_v37 }
0x1758   :  { %v2519_v38 = vpop.eup %2518 }
0x1759   :  { %v1741_v42 = vmul.f32 %v2519_v38, %v1542_v18 }
0x17bc   :  { %v1744_v40 = vpop.permute.xlu1 %1743 }
0x17bd   :  { %v1746_v41 = vmul.f32 %v2519_v38, %v1744_v40 }
0x17bf   :  { %1748 = vrot.lane.b32.xlu0 %v1746_v41, %s2649_s3 }
0x1831   :  { %v1749_v43 = vpop.permute.xlu0 %1748 }
0x1832   :  { %v1751_v44 = vadd.f32 %v1749_v43, %v1741_v42 }
0x1834   :  { %2520 = vtanh.f32 %v1751_v44 }
0x183e   :  { %v2521_v47 = vpop.eup %2520 }
0x183f   :  { %1754 = vrot.lane.b32.xlu1 %v2521_v47, %s2649_s3 }
0x18b1   :  { %v1755_v45 = vpop.permute.xlu1 %1754 }
0x18b2   :  { %v1757_v46 = vmul.f32 %v2519_v38, %v1755_v45 }
0x18b4   :  { %1759 = vrot.lane.b32.xlu0 %v1757_v46, %s2651_s6 }
0x1926   :  { %v1760_v48 = vpop.permute.xlu0 %1759 }
0x1927   :  { %1762 = vst.msk [vmem:[#allocation10] sm:$0xff] %vm195_vm3, %v1760_v48 }
0x1928   :  { %2621 = shalt.err (!%p2618_p8)
}
0x1929   :  { %s2622_s24 = scalar_lea.hbm %s3109_s5, 128 }
0x192a   :  { %p2623_p9 = scmp.ne.s32.totalorder %s3109_s5, %s2622_s24  ;;  %p2626_p10 = scmp.lt.u32.totalorder %s2622_s24, %s3109_s5 }
0x192c   :  { %p2628_p11 = pnand %p2626_p10, %p2623_p9 }
0x192e   :  { %2631 = shalt.err (!%p2628_p11)
}
0x192f   :  { %1772 = dma.vmem_to_hbm [thread:$0]  %s1770_s19, 128, %s3109_s5, [#allocation4]  }
0x1930   :  { %2638 = dma.done.wait [#allocation4], 128  }
0x1931   :  { %2639 = vsyncadd [#allocation4], 4294967168 }
0x1932   :  { %1776 = vsyncpa [#allocation3], 1 }
0x1933   :  { %1777 = vsyncpa [#allocation6], 1 }
0x1934   :  { %1778 = vsyncpa [#allocation9], 1 }
0x1935   :  { %1779 = vsyncpa [#allocation4], 1 }

</bundles_post_ra>
